<compile_context>
chip_gen: v7x
topology: tpu7x:2x2x1
jax: 0.10.0
libtpu: 0.0.40
codegen_flags: <defaults>
</compile_context>

<pallas_src>
import functools

import numpy as np

import jax
import jax.numpy as jnp
from jax import lax
from jax.experimental import pallas as pl
from jax.experimental.pallas import tpu as pltpu


def _gca_kernel(x_ref, g_ref, w_ref, bv_ref, gamma_ref, o_ref):
    """Fused AdaptiveMaxPool2d + NonLocalBlock + sigmoid.

    x_ref    : [B*C, H*W]       input features, free NCHW reshape
    g_ref    : [kh*kw, H*W, N]  0/1 phase-selection matrices (compile-time const)
    w_ref    : [2C+1, C]        stacked weights [ (Wq^T Wk)^T ; Wv ; bq^T Wk ]
    bv_ref   : [C, 1]           value-conv bias
    gamma_ref: [1, 1]           SMEM scalar
    o_ref    : [B, C, N]        sigmoid(non_local(pooled))
    """
    B, C, N = o_ref.shape
    n_phase = g_ref.shape[0]

    x_all = x_ref[...]                                    # [B*C, H*W] lane-dense

    # ---- AdaptiveMaxPool2d(scale): max over kh*kw exact MXU "gathers" --------
    pooled = jnp.dot(x_all, g_ref[0], preferred_element_type=jnp.float32)
    for ph in range(1, n_phase):                          # tiny & static -> unrolled
        pooled = jnp.maximum(
            pooled, jnp.dot(x_all, g_ref[ph], preferred_element_type=jnp.float32))
    # pooled: [B*C, N], channel-major per batch

    w = w_ref[...]                                        # [2C+1, C]
    bv = bv_ref[...]                                      # [C, 1]
    gamma = gamma_ref[0, 0]

    # ---- NonLocalBlock + sigmoid, per batch (B tiny & static -> unrolled) ----
    for b in range(B):
        x_cm = pooled[b * C:(b + 1) * C, :]               # [C, N]

        # All projections in ONE MXU matmul:
        #   p = [ (Wq^T Wk)^T x ; Wv x ; (bq^T Wk) x ]
        p = jnp.dot(w, x_cm, preferred_element_type=jnp.float32)      # [2C+1, N]
        xm_cm = p[:C, :]                                  # [C, N]
        v_cm = p[C:2 * C, :] + bv                         # [C, N] value features
        krow = p[2 * C:2 * C + 1, :]                      # [1, N] energy bias row

        # energy[i, j] = (Wq x_i).(Wk x_j) + bq.(Wk x_j)   (bk cancels in softmax)
        energy = jnp.dot(xm_cm.T, x_cm, preferred_element_type=jnp.float32) + krow

        # numerically-stable row softmax; reciprocal runs on the EUP slot
        energy = energy - jnp.max(energy, axis=-1, keepdims=True)
        pexp = jnp.exp(energy)
        attn = pexp * pl.reciprocal(jnp.sum(pexp, axis=-1, keepdims=True),
                                    approx=True)          # [N, N]

        # out[c, i] = sum_j v[c, j] * attn[i, j]   (contract last dims, no transpose)
        out_cm = lax.dot_general(v_cm, attn, (((1,), (1,)), ((), ())),
                                 preferred_element_type=jnp.float32)  # [C, N]

        o_ref[b] = jax.nn.sigmoid(gamma * out_cm + x_cm)


@functools.partial(jax.jit, static_argnames=("scale",))
def gca_channel_forward(x, params, scale):
    """x: [B, C, H, W] float32 (NCHW). Returns [B, C, scale, scale]."""
    B, C, H, W = x.shape
    # TODO(synk): general AdaptiveMaxPool2d (non-divisible H, W) needs
    # variable-size windows; only the divisible case is implemented.
    assert H % scale == 0 and W % scale == 0, \
        "AdaptiveMaxPool2d == window max pool only for divisible sizes"
    kh, kw = H // scale, W // scale
    N = scale * scale

    wq, bq, wk, bk, wv, bv, gamma = params
    del bk  # bk only shifts each softmax row by a constant -> cancels exactly.

    # Fold query/key convs + energy bias row; stack with the value conv so the
    # kernel does ONE projection matmul per batch.
    me_t = wk.T @ wq                                       # [C, C] = (Wq^T Wk)^T
    kvec = (bq @ wk).reshape(1, C)                         # [1, C] = bq^T Wk
    w_stack = jnp.concatenate([me_t, wv, kvec], axis=0)    # [2C+1, C]
    bv_col = bv.reshape(C, 1)
    gamma_smem = jnp.reshape(gamma, (1, 1)).astype(x.dtype)

    # Compile-time 0/1 selection matrices: phase (r, q) routes input element
    # (si*kh + r)*W + (sj*kw + q)  to pooled position  si*scale + sj.
    g_np = np.zeros((kh * kw, H * W, N), dtype=np.float32)
    for r in range(kh):
        for q in range(kw):
            for si in range(scale):
                for sj in range(scale):
                    g_np[r * kw + q,
                         (si * kh + r) * W + sj * kw + q,
                         si * scale + sj] = 1.0
    g = jnp.asarray(g_np)

    x2d = x.reshape(B * C, H * W)                          # free reshape (NCHW)

    vmem = pl.BlockSpec(memory_space=pltpu.MemorySpace.VMEM)
    smem = pl.BlockSpec(memory_space=pltpu.MemorySpace.SMEM)

    out_cn = pl.pallas_call(
        _gca_kernel,
        out_shape=jax.ShapeDtypeStruct((B, C, N), x.dtype),
        in_specs=[vmem, vmem, vmem, vmem, smem],
        out_specs=vmem,
    )(x2d, g, w_stack, bv_col, gamma_smem)

    return out_cn.reshape(B, C, scale, scale)              # free reshape (NCHW out)


def init_params(key, planes, reduce_ratio_nl):
    """Deterministic synthetic init; PyTorch conv convention W: [out, in]."""
    inter = planes // reduce_ratio_nl
    k = jax.random.split(key, 6)
    s = 0.1
    wq = (s * jax.random.normal(k[0], (inter, planes))).astype(jnp.float32)
    bq = (s * jax.random.normal(k[1], (inter,))).astype(jnp.float32)
    wk = (s * jax.random.normal(k[2], (inter, planes))).astype(jnp.float32)
    bk = (s * jax.random.normal(k[3], (inter,))).astype(jnp.float32)
    wv = (s * jax.random.normal(k[4], (planes, planes))).astype(jnp.float32)
    bv = (s * jax.random.normal(k[5], (planes,))).astype(jnp.float32)
    # PyTorch inits gamma to 0 (which disables the attention branch); use a
    # nonzero deterministic value so the attention path is actually exercised.
    gamma = jnp.float32(0.3)
    return (wq, bq, wk, bk, wv, bv, gamma)


def _reference(x, params, scale):
    """Pure-JAX reference of GCA_Channel.forward (att_mode='origin')."""
    wq, bq, wk, bk, wv, bv, gamma = params
    B, C, H, W = x.shape
    kh, kw = H // scale, W // scale
    N = scale * scale
    pooled = x.reshape(B, C, scale, kh, scale, kw).max(axis=(3, 5))
    xc = pooled.reshape(B, C, N)                                   # [B, C, N]
    q = jnp.einsum("oc,bcn->bon", wq, xc) + bq[None, :, None]      # [B, Ci, N]
    k = jnp.einsum("oc,bcn->bon", wk, xc) + bk[None, :, None]      # [B, Ci, N]
    v = jnp.einsum("oc,bcn->bon", wv, xc) + bv[None, :, None]      # [B, C, N]
    energy = jnp.einsum("bci,bcj->bij", q, k)                      # [B, N, N]
    attn = jax.nn.softmax(energy, axis=-1)
    out = jnp.einsum("bcj,bij->bci", v, attn)                      # [B, C, N]
    out = gamma * out + xc
    return jax.nn.sigmoid(out).reshape(B, C, scale, scale)


if __name__ == "__main__":
    # planes=32, scale=8, reduce_ratio_nl=8  ->  N=64 pooled positions, Ci=4
    B, planes, H, W = 2, 32, 16, 16
    scale, reduce_ratio_nl = 8, 8

    key = jax.random.PRNGKey(0)
    kx, kp = jax.random.split(key)
    x = jax.random.normal(kx, (B, planes, H, W), dtype=jnp.float32)
    params = init_params(kp, planes, reduce_ratio_nl)

    out = gca_channel_forward(x, params, scale=scale)
    out = jax.block_until_ready(out)

    ref = _reference(x, params, scale)
    assert out.shape == (B, planes, scale, scale)
    # Approx reciprocal, folded-bias algebra and MXU matmul rounding introduce
    # small (~1e-3) deviations; outputs are sigmoid-bounded in (0, 1).
    assert jnp.allclose(out, ref, rtol=3e-3, atol=3e-3), "mismatch vs reference"

    print("KERNEL_OK")
</pallas_src>

<mosaic_0001>
module attributes {stable_mosaic.version = 11 : i64} {
  func.func @_gca_kernel(%arg0: memref<64x256xf32, #tpu.memory_space<vmem>>, %arg1: memref<4x256x64xf32, #tpu.memory_space<vmem>>, %arg2: memref<65x32xf32, #tpu.memory_space<vmem>>, %arg3: memref<32x1xf32, #tpu.memory_space<vmem>>, %arg4: memref<1x1xf32, #tpu.memory_space<smem>>, %arg5: memref<2x32x64xf32, #tpu.memory_space<vmem>>) attributes {dimension_semantics = [], scalar_prefetch = 0 : i64, scratch_operands = 0 : i64, tpu.core_type = #tpu.core_type<tc>} {
    %c0 = arith.constant 0 : index
    %c0_0 = arith.constant 0 : index
    %0 = vector.load %arg0[%c0, %c0_0] : memref<64x256xf32, #tpu.memory_space<vmem>>, vector<64x256xf32>
    %c0_1 = arith.constant 0 : index
    %c0_2 = arith.constant 0 : index
    %c0_3 = arith.constant 0 : index
    %1 = vector.load %arg1[%c0_1, %c0_2, %c0_3] : memref<4x256x64xf32, #tpu.memory_space<vmem>>, vector<1x256x64xf32>
    %2 = vector.shape_cast %1 : vector<1x256x64xf32> to vector<256x64xf32>
    %cst = arith.constant dense<0.000000e+00> : vector<64x64xf32>
    %3 = tpu.matmul %0, %2, %cst {dimension_numbers = #tpu.dot_dimension_numbers<[1], [0], [0], [1], [0, 0, 1, 1], [], []>} : vector<64x256xf32>, vector<256x64xf32>, vector<64x64xf32> -> vector<64x64xf32>
    %c1 = arith.constant 1 : index
    %c0_4 = arith.constant 0 : index
    %c0_5 = arith.constant 0 : index
    %4 = vector.load %arg1[%c1, %c0_4, %c0_5] : memref<4x256x64xf32, #tpu.memory_space<vmem>>, vector<1x256x64xf32>
    %5 = vector.shape_cast %4 : vector<1x256x64xf32> to vector<256x64xf32>
    %cst_6 = arith.constant dense<0.000000e+00> : vector<64x64xf32>
    %6 = tpu.matmul %0, %5, %cst_6 {dimension_numbers = #tpu.dot_dimension_numbers<[1], [0], [0], [1], [0, 0, 1, 1], [], []>} : vector<64x256xf32>, vector<256x64xf32>, vector<64x64xf32> -> vector<64x64xf32>
    %7 = arith.maximumf %3, %6 : vector<64x64xf32>
    %c2 = arith.constant 2 : index
    %c0_7 = arith.constant 0 : index
    %c0_8 = arith.constant 0 : index
    %8 = vector.load %arg1[%c2, %c0_7, %c0_8] : memref<4x256x64xf32, #tpu.memory_space<vmem>>, vector<1x256x64xf32>
    %9 = vector.shape_cast %8 : vector<1x256x64xf32> to vector<256x64xf32>
    %cst_9 = arith.constant dense<0.000000e+00> : vector<64x64xf32>
    %10 = tpu.matmul %0, %9, %cst_9 {dimension_numbers = #tpu.dot_dimension_numbers<[1], [0], [0], [1], [0, 0, 1, 1], [], []>} : vector<64x256xf32>, vector<256x64xf32>, vector<64x64xf32> -> vector<64x64xf32>
    %11 = arith.maximumf %7, %10 : vector<64x64xf32>
    %c3 = arith.constant 3 : index
    %c0_10 = arith.constant 0 : index
    %c0_11 = arith.constant 0 : index
    %12 = vector.load %arg1[%c3, %c0_10, %c0_11] : memref<4x256x64xf32, #tpu.memory_space<vmem>>, vector<1x256x64xf32>
    %13 = vector.shape_cast %12 : vector<1x256x64xf32> to vector<256x64xf32>
    %cst_12 = arith.constant dense<0.000000e+00> : vector<64x64xf32>
    %14 = tpu.matmul %0, %13, %cst_12 {dimension_numbers = #tpu.dot_dimension_numbers<[1], [0], [0], [1], [0, 0, 1, 1], [], []>} : vector<64x256xf32>, vector<256x64xf32>, vector<64x64xf32> -> vector<64x64xf32>
    %15 = arith.maximumf %11, %14 : vector<64x64xf32>
    %c0_13 = arith.constant 0 : index
    %c0_14 = arith.constant 0 : index
    %16 = vector.load %arg2[%c0_13, %c0_14] : memref<65x32xf32, #tpu.memory_space<vmem>>, vector<65x32xf32>
    %c0_15 = arith.constant 0 : index
    %c0_16 = arith.constant 0 : index
    %17 = vector.load %arg3[%c0_15, %c0_16] : memref<32x1xf32, #tpu.memory_space<vmem>>, vector<32x1xf32>
    %c0_17 = arith.constant 0 : index
    %c0_18 = arith.constant 0 : index
    %18 = memref.load %arg4[%c0_17, %c0_18] : memref<1x1xf32, #tpu.memory_space<smem>>
    %19 = vector.extract_strided_slice %15 {offsets = [0, 0], sizes = [32, 64], strides = [1, 1]} : vector<64x64xf32> to vector<32x64xf32>
    %cst_19 = arith.constant dense<0.000000e+00> : vector<65x64xf32>
    %20 = tpu.matmul %16, %19, %cst_19 {dimension_numbers = #tpu.dot_dimension_numbers<[1], [0], [0], [1], [0, 0, 1, 1], [], []>} : vector<65x32xf32>, vector<32x64xf32>, vector<65x64xf32> -> vector<65x64xf32>
    %21 = vector.extract_strided_slice %20 {offsets = [0, 0], sizes = [32, 64], strides = [1, 1]} : vector<65x64xf32> to vector<32x64xf32>
    %22 = vector.extract_strided_slice %20 {offsets = [32, 0], sizes = [32, 64], strides = [1, 1]} : vector<65x64xf32> to vector<32x64xf32>
    %23 = vector.broadcast %17 : vector<32x1xf32> to vector<32x64xf32>
    %24 = arith.addf %22, %23 : vector<32x64xf32>
    %25 = vector.extract_strided_slice %20 {offsets = [64, 0], sizes = [1, 64], strides = [1, 1]} : vector<65x64xf32> to vector<1x64xf32>
    %26 = tpu.transpose %21, [1, 0] : vector<32x64xf32> -> vector<64x32xf32>
    %cst_20 = arith.constant dense<0.000000e+00> : vector<64x64xf32>
    %27 = tpu.matmul %26, %19, %cst_20 {dimension_numbers = #tpu.dot_dimension_numbers<[1], [0], [0], [1], [0, 0, 1, 1], [], []>} : vector<64x32xf32>, vector<32x64xf32>, vector<64x64xf32> -> vector<64x64xf32>
    %28 = vector.broadcast %25 : vector<1x64xf32> to vector<64x64xf32>
    %29 = arith.addf %27, %28 : vector<64x64xf32>
    %cst_21 = arith.constant dense<0xFF800000> : vector<64xf32>
    %30 = vector.multi_reduction <maximumf>, %29, %cst_21 [1] : vector<64x64xf32> to vector<64xf32>
    %31 = vector.shape_cast %30 : vector<64xf32> to vector<64x1xf32>
    %32 = vector.broadcast %31 : vector<64x1xf32> to vector<64x64xf32>
    %33 = arith.subf %29, %32 : vector<64x64xf32>
    %34 = math.exp %33 : vector<64x64xf32>
    %cst_22 = arith.constant dense<0.000000e+00> : vector<64xf32>
    %35 = vector.multi_reduction <add>, %34, %cst_22 [1] : vector<64x64xf32> to vector<64xf32>
    %36 = vector.shape_cast %35 : vector<64xf32> to vector<64x1xf32>
    %37 = tpu.reciprocal %36 {approx = true} : vector<64x1xf32> -> vector<64x1xf32>
    %38 = vector.broadcast %37 : vector<64x1xf32> to vector<64x64xf32>
    %39 = arith.mulf %34, %38 : vector<64x64xf32>
    %cst_23 = arith.constant dense<0.000000e+00> : vector<32x64xf32>
    %40 = tpu.matmul %24, %39, %cst_23 {dimension_numbers = #tpu.dot_dimension_numbers<[1], [1], [0], [0], [0, 0, 1, 0], [], []>} : vector<32x64xf32>, vector<64x64xf32>, vector<32x64xf32> -> vector<32x64xf32>
    %41 = vector.broadcast %18 : f32 to vector<32x64xf32>
    %42 = arith.mulf %41, %40 : vector<32x64xf32>
    %43 = arith.addf %42, %19 : vector<32x64xf32>
    %44 = arith.negf %43 : vector<32x64xf32>
    %45 = math.exp %44 : vector<32x64xf32>
    %cst_24 = arith.constant 1.000000e+00 : f32
    %46 = vector.broadcast %cst_24 : f32 to vector<32x64xf32>
    %47 = arith.addf %46, %45 : vector<32x64xf32>
    %48 = arith.divf %46, %47 : vector<32x64xf32>
    %c0_25 = arith.constant 0 : index
    %c0_26 = arith.constant 0 : index
    %c0_27 = arith.constant 0 : index
    %49 = vector.load %arg5[%c0_25, %c0_26, %c0_27] : memref<2x32x64xf32, #tpu.memory_space<vmem>>, vector<1x32x64xf32>
    %50 = vector.shape_cast %49 : vector<1x32x64xf32> to vector<32x64xf32>
    %51 = vector.shape_cast %48 : vector<32x64xf32> to vector<1x32x64xf32>
    tpu.vector_store %arg5[%c0_25, %c0_26, %c0_27], %51 {strides = array<i32>} : memref<2x32x64xf32, #tpu.memory_space<vmem>>, vector<1x32x64xf32>,
    %52 = vector.extract_strided_slice %15 {offsets = [32, 0], sizes = [32, 64], strides = [1, 1]} : vector<64x64xf32> to vector<32x64xf32>
    %cst_28 = arith.constant dense<0.000000e+00> : vector<65x64xf32>
    %53 = tpu.matmul %16, %52, %cst_28 {dimension_numbers = #tpu.dot_dimension_numbers<[1], [0], [0], [1], [0, 0, 1, 1], [], []>} : vector<65x32xf32>, vector<32x64xf32>, vector<65x64xf32> -> vector<65x64xf32>
    %54 = vector.extract_strided_slice %53 {offsets = [0, 0], sizes = [32, 64], strides = [1, 1]} : vector<65x64xf32> to vector<32x64xf32>
    %55 = vector.extract_strided_slice %53 {offsets = [32, 0], sizes = [32, 64], strides = [1, 1]} : vector<65x64xf32> to vector<32x64xf32>
    %56 = vector.broadcast %17 : vector<32x1xf32> to vector<32x64xf32>
    %57 = arith.addf %55, %56 : vector<32x64xf32>
    %58 = vector.extract_strided_slice %53 {offsets = [64, 0], sizes = [1, 64], strides = [1, 1]} : vector<65x64xf32> to vector<1x64xf32>
    %59 = tpu.transpose %54, [1, 0] : vector<32x64xf32> -> vector<64x32xf32>
    %cst_29 = arith.constant dense<0.000000e+00> : vector<64x64xf32>
    %60 = tpu.matmul %59, %52, %cst_29 {dimension_numbers = #tpu.dot_dimension_numbers<[1], [0], [0], [1], [0, 0, 1, 1], [], []>} : vector<64x32xf32>, vector<32x64xf32>, vector<64x64xf32> -> vector<64x64xf32>
    %61 = vector.broadcast %58 : vector<1x64xf32> to vector<64x64xf32>
    %62 = arith.addf %60, %61 : vector<64x64xf32>
    %cst_30 = arith.constant dense<0xFF800000> : vector<64xf32>
    %63 = vector.multi_reduction <maximumf>, %62, %cst_30 [1] : vector<64x64xf32> to vector<64xf32>
    %64 = vector.shape_cast %63 : vector<64xf32> to vector<64x1xf32>
    %65 = vector.broadcast %64 : vector<64x1xf32> to vector<64x64xf32>
    %66 = arith.subf %62, %65 : vector<64x64xf32>
    %67 = math.exp %66 : vector<64x64xf32>
    %cst_31 = arith.constant dense<0.000000e+00> : vector<64xf32>
    %68 = vector.multi_reduction <add>, %67, %cst_31 [1] : vector<64x64xf32> to vector<64xf32>
    %69 = vector.shape_cast %68 : vector<64xf32> to vector<64x1xf32>
    %70 = tpu.reciprocal %69 {approx = true} : vector<64x1xf32> -> vector<64x1xf32>
    %71 = vector.broadcast %70 : vector<64x1xf32> to vector<64x64xf32>
    %72 = arith.mulf %67, %71 : vector<64x64xf32>
    %cst_32 = arith.constant dense<0.000000e+00> : vector<32x64xf32>
    %73 = tpu.matmul %57, %72, %cst_32 {dimension_numbers = #tpu.dot_dimension_numbers<[1], [1], [0], [0], [0, 0, 1, 0], [], []>} : vector<32x64xf32>, vector<64x64xf32>, vector<32x64xf32> -> vector<32x64xf32>
    %74 = vector.broadcast %18 : f32 to vector<32x64xf32>
    %75 = arith.mulf %74, %73 : vector<32x64xf32>
    %76 = arith.addf %75, %52 : vector<32x64xf32>
    %77 = arith.negf %76 : vector<32x64xf32>
    %78 = math.exp %77 : vector<32x64xf32>
    %cst_33 = arith.constant 1.000000e+00 : f32
    %79 = vector.broadcast %cst_33 : f32 to vector<32x64xf32>
    %80 = arith.addf %79, %78 : vector<32x64xf32>
    %81 = arith.divf %79, %80 : vector<32x64xf32>
    %c1_34 = arith.constant 1 : index
    %c0_35 = arith.constant 0 : index
    %c0_36 = arith.constant 0 : index
    %82 = vector.load %arg5[%c1_34, %c0_35, %c0_36] : memref<2x32x64xf32, #tpu.memory_space<vmem>>, vector<1x32x64xf32>
    %83 = vector.shape_cast %82 : vector<1x32x64xf32> to vector<32x64xf32>
    %84 = vector.shape_cast %81 : vector<32x64xf32> to vector<1x32x64xf32>
    tpu.vector_store %arg5[%c1_34, %c0_35, %c0_36], %84 {strides = array<i32>} : memref<2x32x64xf32, #tpu.memory_space<vmem>>, vector<1x32x64xf32>,
    return
  }
}

</mosaic_0001>

<bundles_post_ra>
// kernel: gca_channel_forward.1
= control target key start
LH: loop header
LB: loop body
LE: loop exit
PB: predicated region body
PF: predicated region fallthrough
CT: control target
= control target key end

     0   :  { %vm2658_vm0 = vmmov 0   ;;  %vm626_vm1 = vcmask 261120   ;;  %vm953_vm2 = vcmask 523264   ;;  %s3602_s1 = inlined_call_operand.vmem [shape: f32[4,256,64], index: 1, kind: input, shape index: {}]   ;;  %s3603_s0 = inlined_call_operand.vmem [shape: f32[64,256], index: 0, kind: input, shape index: {}]   ;;  %s3604_s2 = inlined_call_operand.vmem [shape: f32[65,32], index: 2, kind: input, shape index: {}]   ;;  %s3605_s3 = inlined_call_operand.vmem [shape: f32[32,1], index: 3, kind: input, shape index: {}]   ;;  %s3606_s4 = inlined_call_operand.<no memory space> [shape: f32[1,1], index: 4, kind: input, shape index: {}]   ;;  %s3607_s5 = inlined_call_operand.vmem [shape: f32[2,32,64], index: 5, kind: output, shape index: {}]  }
   0x1   :  { %v53_v0 = vld [vmem:[%s3602_s1 + $0x80] sm:$0xff]  ;;  %v54_v1 = vld [vmem:[%s3602_s1 + $0x88] sm:$0xff]  ;;  %v55_v11 = vld [vmem:[%s3602_s1 + $0x90] sm:$0xff] }
   0x2   :  { %v1745_v2 = vld [vmem:[%s3602_s1 + $0x180] sm:$0xff]  ;;  %v2347_v3 = vpack.c.bf16 %v54_v1, %v53_v0  ;;  %v1746_v4 = vld [vmem:[%s3602_s1 + $0x188] sm:$0xff]  ;;  %v56_v13 = vld [vmem:[%s3602_s1 + $0x98] sm:$0xff] }
   0x3   :  { %v37_v5 = vld [vmem:[%s3602_s1] sm:$0xff]  ;;  %v38_v6 = vld [vmem:[%s3602_s1 + $0x8] sm:$0xff]  ;;  %v2379_v7 = vpack.c.bf16 %v1746_v4, %v1745_v2  ;;  %v1747_v14 = vld [vmem:[%s3602_s1 + $0x190] sm:$0xff]  ;;  %v2351_v16 = vpack.c.bf16 %v56_v13, %v55_v11 }
   0x4   :  { %v2349_v8 = vpack.c.bf16 %v38_v6, %v37_v5  ;;  %v1729_v9 = vld [vmem:[%s3602_s1 + $0x100] sm:$0xff]  ;;  %v1730_v10 = vld [vmem:[%s3602_s1 + $0x108] sm:$0xff]  ;;  %2348 = vmatprep.subr.bf16.mxu0 %v2347_v3  ;;  %v1748_v15 = vld [vmem:[%s3602_s1 + $0x198] sm:$0xff] }
   0x5   :  { %v2381_v12 = vpack.c.bf16 %v1730_v10, %v1729_v9  ;;  %2380 = vmatprep.subr.bf16.mxu1 %v2379_v7  ;;  %v2383_v17 = vpack.c.bf16 %v1748_v15, %v1747_v14  ;;  %v39_v18 = vld [vmem:[%s3602_s1 + $0x10] sm:$0xff]  ;;  %v40_v19 = vld [vmem:[%s3602_s1 + $0x18] sm:$0xff]  ;;  %v57_v23 = vld [vmem:[%s3602_s1 + $0xa0] sm:$0xff] }
   0x6   :  { %2350 = vmatpush3.bf16.msra.mxu0 %v2349_v8  ;;  %v1731_v20 = vld [vmem:[%s3602_s1 + $0x110] sm:$0xff]  ;;  %v2353_v21 = vpack.c.bf16 %v40_v19, %v39_v18  ;;  %v1732_v22 = vld [vmem:[%s3602_s1 + $0x118] sm:$0xff]  ;;  %v58_v24 = vld [vmem:[%s3602_s1 + $0xa8] sm:$0xff] }
   0x7   :  { %2382 = vmatpush3.bf16.msra.mxu1 %v2381_v12  ;;  %2352 = vmatprep.subr.bf16.mxu0 %v2351_v16  ;;  %v2385_v25 = vpack.c.bf16 %v1732_v22, %v1731_v20  ;;  %v2355_v26 = vpack.c.bf16 %v58_v24, %v57_v23  ;;  %v1749_v27 = vld [vmem:[%s3602_s1 + $0x1a0] sm:$0xff]  ;;  %v1750_v28 = vld [vmem:[%s3602_s1 + $0x1a8] sm:$0xff]  ;;  %v59_v35 = vld [vmem:[%s3602_s1 + $0xb0] sm:$0xff] }
   0x8   :  { %2384 = vmatprep.subr.bf16.mxu1 %v2383_v17  ;;  %v41_v29 = vld [vmem:[%s3602_s1 + $0x20] sm:$0xff]  ;;  %v2387_v30 = vpack.c.bf16 %v1750_v28, %v1749_v27  ;;  %v42_v31 = vld [vmem:[%s3602_s1 + $0x28] sm:$0xff]  ;;  %v60_v36 = vld [vmem:[%s3602_s1 + $0xb8] sm:$0xff] }
   0x9   :  { %v1733_v32 = vld [vmem:[%s3602_s1 + $0x120] sm:$0xff]  ;;  %v1734_v33 = vld [vmem:[%s3602_s1 + $0x128] sm:$0xff]  ;;  %v2357_v34 = vpack.c.bf16 %v42_v31, %v41_v29  ;;  %v1751_v37 = vld [vmem:[%s3602_s1 + $0x1b0] sm:$0xff]  ;;  %v2359_v39 = vpack.c.bf16 %v60_v36, %v59_v35 }
   0xa   :  { %2354 = vmatpush3.bf16.msra.mxu0 %v2353_v21  ;;  %v2389_v38 = vpack.c.bf16 %v1734_v33, %v1733_v32  ;;  %v1752_v40 = vld [vmem:[%s3602_s1 + $0x1b8] sm:$0xff]  ;;  %v43_v41 = vld [vmem:[%s3602_s1 + $0x30] sm:$0xff]  ;;  %v61_v46 = vld [vmem:[%s3602_s1 + $0xc0] sm:$0xff] }
   0xb   :  { %2386 = vmatpush3.bf16.msra.mxu1 %v2385_v25  ;;  %2356 = vmatprep.subr.bf16.mxu0 %v2355_v26  ;;  %v44_v42 = vld [vmem:[%s3602_s1 + $0x38] sm:$0xff]  ;;  %v2391_v43 = vpack.c.bf16 %v1752_v40, %v1751_v37  ;;  %v1735_v44 = vld [vmem:[%s3602_s1 + $0x130] sm:$0xff]  ;;  %v62_v47 = vld [vmem:[%s3602_s1 + $0xc8] sm:$0xff] }
   0xc   :  { %2388 = vmatprep.subr.bf16.mxu1 %v2387_v30  ;;  %v1736_v45 = vld [vmem:[%s3602_s1 + $0x138] sm:$0xff]  ;;  %v1753_v48 = vld [vmem:[%s3602_s1 + $0x1c0] sm:$0xff]  ;;  %v1754_v49 = vld [vmem:[%s3602_s1 + $0x1c8] sm:$0xff]  ;;  %v2361_v50 = vpack.c.bf16 %v44_v42, %v43_v41  ;;  %v2363_v52 = vpack.c.bf16 %v62_v47, %v61_v46 }
   0xd   :  { %v2393_v51 = vpack.c.bf16 %v1736_v45, %v1735_v44  ;;  %v45_v53 = vld [vmem:[%s3602_s1 + $0x40] sm:$0xff]  ;;  %v46_v54 = vld [vmem:[%s3602_s1 + $0x48] sm:$0xff]  ;;  %v2395_v56 = vpack.c.bf16 %v1754_v49, %v1753_v48  ;;  %v63_v58 = vld [vmem:[%s3602_s1 + $0xd0] sm:$0xff] }
   0xe   :  { %2358 = vmatpush3.bf16.msra.mxu0 %v2357_v34  ;;  %v1737_v55 = vld [vmem:[%s3602_s1 + $0x140] sm:$0xff]  ;;  %v1738_v57 = vld [vmem:[%s3602_s1 + $0x148] sm:$0xff]  ;;  %v64_v59 = vld [vmem:[%s3602_s1 + $0xd8] sm:$0xff]  ;;  %v2365_v62 = vpack.c.bf16 %v46_v54, %v45_v53 }
   0xf   :  { %2390 = vmatpush3.bf16.msra.mxu1 %v2389_v38  ;;  %2360 = vmatprep.subr.bf16.mxu0 %v2359_v39  ;;  %v1755_v60 = vld [vmem:[%s3602_s1 + $0x1d0] sm:$0xff]  ;;  %v1756_v61 = vld [vmem:[%s3602_s1 + $0x1d8] sm:$0xff]  ;;  %v2397_v63 = vpack.c.bf16 %v1738_v57, %v1737_v55  ;;  %v2367_v0 = vpack.c.bf16 %v64_v59, %v63_v58  ;;  %v65_v6 = vld [vmem:[%s3602_s1 + $0xe0] sm:$0xff] }
  0x10   :  { %2392 = vmatprep.subr.bf16.mxu1 %v2391_v43  ;;  %v47_v1 = vld [vmem:[%s3602_s1 + $0x50] sm:$0xff]  ;;  %v48_v2 = vld [vmem:[%s3602_s1 + $0x58] sm:$0xff]  ;;  %v2399_v4 = vpack.c.bf16 %v1756_v61, %v1755_v60  ;;  %v66_v7 = vld [vmem:[%s3602_s1 + $0xe8] sm:$0xff] }
  0x11   :  { %v1739_v3 = vld [vmem:[%s3602_s1 + $0x150] sm:$0xff]  ;;  %v1740_v5 = vld [vmem:[%s3602_s1 + $0x158] sm:$0xff]  ;;  %v1757_v8 = vld [vmem:[%s3602_s1 + $0x1e0] sm:$0xff]  ;;  %v2369_v10 = vpack.c.bf16 %v48_v2, %v47_v1  ;;  %v2371_v13 = vpack.c.bf16 %v66_v7, %v65_v6 }
  0x12   :  { %2362 = vmatpush3.bf16.msra.mxu0 %v2361_v50  ;;  %v1758_v9 = vld [vmem:[%s3602_s1 + $0x1e8] sm:$0xff]  ;;  %v49_v11 = vld [vmem:[%s3602_s1 + $0x60] sm:$0xff]  ;;  %v2401_v12 = vpack.c.bf16 %v1740_v5, %v1739_v3  ;;  %v67_v19 = vld [vmem:[%s3602_s1 + $0xf0] sm:$0xff] }
  0x13   :  { %2394 = vmatpush3.bf16.msra.mxu1 %v2393_v51  ;;  %2364 = vmatprep.subr.bf16.mxu0 %v2363_v52  ;;  %v50_v14 = vld [vmem:[%s3602_s1 + $0x68] sm:$0xff]  ;;  %v1741_v15 = vld [vmem:[%s3602_s1 + $0x160] sm:$0xff]  ;;  %v2403_v17 = vpack.c.bf16 %v1758_v9, %v1757_v8  ;;  %v68_v20 = vld [vmem:[%s3602_s1 + $0xf8] sm:$0xff] }
  0x14   :  { %2396 = vmatprep.subr.bf16.mxu1 %v2395_v56  ;;  %v2859_v16 = vld [vmem:[%s3603_s0 + $0x8] sm:$0xff]  ;;  %v1759_v21 = vld [vmem:[%s3602_s1 + $0x1f0] sm:$0xff]  ;;  %v1760_v22 = vld [vmem:[%s3602_s1 + $0x1f8] sm:$0xff]  ;;  %v2373_v23 = vpack.c.bf16 %v50_v14, %v49_v11  ;;  %v2375_v25 = vpack.c.bf16 %v68_v20, %v67_v19 }
  0x15   :  { %v1742_v18 = vld [vmem:[%s3602_s1 + $0x168] sm:$0xff]  ;;  %133 = vmatprep.mubr.f32.mxu0 %v2859_v16  ;;  %271 = vmatprep.mubr.f32.mxu1 %v2859_v16  ;;  %v51_v26 = vld [vmem:[%s3602_s1 + $0x70] sm:$0xff]  ;;  %v52_v27 = vld [vmem:[%s3602_s1 + $0x78] sm:$0xff]  ;;  %v2407_v29 = vpack.c.bf16 %v1760_v22, %v1759_v21 }
  0x16   :  { %2366 = vmatpush3.bf16.msra.mxu0 %v2365_v62  ;;  %v2405_v24 = vpack.c.bf16 %v1742_v18, %v1741_v15  ;;  %v1743_v28 = vld [vmem:[%s3602_s1 + $0x170] sm:$0xff]  ;;  %v1744_v30 = vld [vmem:[%s3602_s1 + $0x178] sm:$0xff]  ;;  %v1777_v31 = vld [vmem:[%s3602_s1 + $0x280] sm:$0xff]  ;;  %v2377_v35 = vpack.c.bf16 %v52_v27, %v51_v26 }
  0x17   :  { %2398 = vmatpush3.bf16.msra.mxu1 %v2397_v63  ;;  %2368 = vmatprep.subr.bf16.mxu0 %v2367_v0  ;;  %v1778_v32 = vld [vmem:[%s3602_s1 + $0x288] sm:$0xff]  ;;  %v1809_v33 = vld [vmem:[%s3602_s1 + $0x380] sm:$0xff]  ;;  %v2409_v36 = vpack.c.bf16 %v1744_v30, %v1743_v28  ;;  %v1779_v43 = vld [vmem:[%s3602_s1 + $0x290] sm:$0xff] }
  0x18   :  { %2400 = vmatprep.subr.bf16.mxu1 %v2399_v4  ;;  %v1810_v34 = vld [vmem:[%s3602_s1 + $0x388] sm:$0xff]  ;;  %v2411_v37 = vpack.c.bf16 %v1778_v32, %v1777_v31  ;;  %v1761_v38 = vld [vmem:[%s3602_s1 + $0x200] sm:$0xff]  ;;  %v1780_v44 = vld [vmem:[%s3602_s1 + $0x298] sm:$0xff] }
  0x19   :  { %v1762_v39 = vld [vmem:[%s3602_s1 + $0x208] sm:$0xff]  ;;  %v2443_v40 = vpack.c.bf16 %v1810_v34, %v1809_v33  ;;  %v1793_v41 = vld [vmem:[%s3602_s1 + $0x300] sm:$0xff]  ;;  %v1811_v47 = vld [vmem:[%s3602_s1 + $0x390] sm:$0xff]  ;;  %v2415_v53 = vpack.c.bf16 %v1780_v44, %v1779_v43 }
  0x1a   :  { %2370 = vmatpush3.bf16.msra.mxu0 %v2369_v10  ;;  %v1794_v42 = vld [vmem:[%s3602_s1 + $0x308] sm:$0xff]  ;;  %v2923_v45 = vld [vmem:[%s3603_s0] sm:$0xff]  ;;  %v2413_v46 = vpack.c.bf16 %v1762_v39, %v1761_v38  ;;  %v1812_v48 = vld [vmem:[%s3602_s1 + $0x398] sm:$0xff] }
  0x1b   :  { %2402 = vmatpush3.bf16.msra.mxu1 %v2401_v12  ;;  %2372 = vmatprep.subr.bf16.mxu0 %v2371_v13  ;;  %v2445_v49 = vpack.c.bf16 %v1794_v42, %v1793_v41  ;;  %v1763_v50 = vld [vmem:[%s3602_s1 + $0x210] sm:$0xff]  ;;  %v1764_v51 = vld [vmem:[%s3602_s1 + $0x218] sm:$0xff]  ;;  %v2447_v56 = vpack.c.bf16 %v1812_v48, %v1811_v47  ;;  %v1781_v57 = vld [vmem:[%s3602_s1 + $0x2a0] sm:$0xff] }
  0x1c   :  { %2404 = vmatprep.subr.bf16.mxu1 %v2403_v17  ;;  %v2940_v52 = vld [vmem:[%s3603_s0 + $0x18] sm:$0xff]  ;;  %v1795_v54 = vld [vmem:[%s3602_s1 + $0x310] sm:$0xff]  ;;  %v1782_v58 = vld [vmem:[%s3602_s1 + $0x2a8] sm:$0xff]  ;;  %v2417_v60 = vpack.c.bf16 %v1764_v51, %v1763_v50 }
  0x1d   :  { %v1796_v55 = vld [vmem:[%s3602_s1 + $0x318] sm:$0xff]  ;;  %v2959_v59 = vld [vmem:[%s3603_s0 + $0x10] sm:$0xff]  ;;  %v1813_v61 = vld [vmem:[%s3602_s1 + $0x3a0] sm:$0xff]  ;;  %v2419_v3 = vpack.c.bf16 %v1782_v58, %v1781_v57 }
  0x1e   :  { %2374 = vmatpush3.bf16.msra.mxu0 %v2373_v23  ;;  %v1814_v62 = vld [vmem:[%s3602_s1 + $0x3a8] sm:$0xff]  ;;  %v2449_v63 = vpack.c.bf16 %v1796_v55, %v1795_v54  ;;  %v1765_v0 = vld [vmem:[%s3602_s1 + $0x220] sm:$0xff]  ;;  %v1783_v7 = vld [vmem:[%s3602_s1 + $0x2b0] sm:$0xff] }
  0x1f   :  { %2406 = vmatpush3.bf16.msra.mxu1 %v2405_v24  ;;  %2376 = vmatprep.subr.bf16.mxu0 %v2375_v25  ;;  %v1766_v1 = vld [vmem:[%s3602_s1 + $0x228] sm:$0xff]  ;;  %v1797_v4 = vld [vmem:[%s3602_s1 + $0x320] sm:$0xff]  ;;  %v2451_v6 = vpack.c.bf16 %v1814_v62, %v1813_v61  ;;  %v1784_v8 = vld [vmem:[%s3602_s1 + $0x2b8] sm:$0xff] }
  0x20   :  { %2408 = vmatprep.subr.bf16.mxu1 %v2407_v29  ;;  %v2978_v2 = vld [vmem:[%s3603_s0 + $0x28] sm:$0xff]  ;;  %v2997_v9 = vld [vmem:[%s3603_s0 + $0x20] sm:$0xff]  ;;  %v2421_v10 = vpack.c.bf16 %v1766_v1, %v1765_v0  ;;  %v1815_v11 = vld [vmem:[%s3602_s1 + $0x3b0] sm:$0xff]  ;;  %v2423_v18 = vpack.c.bf16 %v1784_v8, %v1783_v7 }
  0x21   :  { %v1798_v5 = vld [vmem:[%s3602_s1 + $0x328] sm:$0xff]  ;;  %v1816_v12 = vld [vmem:[%s3602_s1 + $0x3b8] sm:$0xff]  ;;  %v1767_v14 = vld [vmem:[%s3602_s1 + $0x230] sm:$0xff] }
  0x22   :  { %2378 = vmatpush3.bf16.msra.mxu0 %v2377_v35  ;;  %v2453_v13 = vpack.c.bf16 %v1798_v5, %v1797_v4  ;;  %v1768_v15 = vld [vmem:[%s3602_s1 + $0x238] sm:$0xff]  ;;  %v1799_v19 = vld [vmem:[%s3602_s1 + $0x330] sm:$0xff]  ;;  %v2455_v21 = vpack.c.bf16 %v1816_v12, %v1815_v11  ;;  %v1785_v22 = vld [vmem:[%s3602_s1 + $0x2c0] sm:$0xff] }
  0x23   :  { %2410 = vmatpush3.bf16.msra.mxu1 %v2409_v36  ;;  %2412 = vmatprep.subr.bf16.mxu0 %v2411_v37  ;;  %v3016_v17 = vld [vmem:[%s3603_s0 + $0x38] sm:$0xff]  ;;  %v1786_v23 = vld [vmem:[%s3602_s1 + $0x2c8] sm:$0xff]  ;;  %v3035_v24 = vld [vmem:[%s3603_s0 + $0x30] sm:$0xff]  ;;  %v2425_v25 = vpack.c.bf16 %v1768_v15, %v1767_v14 }
  0x24   :  { %2444 = vmatprep.subr.bf16.mxu1 %v2443_v40  ;;  %v1800_v20 = vld [vmem:[%s3602_s1 + $0x338] sm:$0xff]  ;;  %v1817_v26 = vld [vmem:[%s3602_s1 + $0x3c0] sm:$0xff]  ;;  %v1818_v27 = vld [vmem:[%s3602_s1 + $0x3c8] sm:$0xff]  ;;  %v2427_v32 = vpack.c.bf16 %v1786_v23, %v1785_v22 }
  0x25   :  { %134 = vmatmul.mubr.f32.vlgmr.msra.gmra.mrb[0].mxu0 %v2923_v45  ;;  %v2457_v28 = vpack.c.bf16 %v1800_v20, %v1799_v19  ;;  %v1769_v29 = vld [vmem:[%s3602_s1 + $0x240] sm:$0xff]  ;;  %v1770_v30 = vld [vmem:[%s3602_s1 + $0x248] sm:$0xff]  ;;  %v2459_v35 = vpack.c.bf16 %v1818_v27, %v1817_v26  ;;  %v1787_v36 = vld [vmem:[%s3602_s1 + $0x2d0] sm:$0xff] }
  0x26   :  { %272 = vmatmul.mubr.f32.vlgmr.msra.gmra.mrb[0].mxu1 %v2923_v45  ;;  %2414 = vmatpush3.bf16.msra.mxu0 %v2413_v46  ;;  %v3054_v31 = vld [vmem:[%s3603_s0 + $0x48] sm:$0xff]  ;;  %v1801_v33 = vld [vmem:[%s3602_s1 + $0x340] sm:$0xff]  ;;  %v1788_v37 = vld [vmem:[%s3602_s1 + $0x2d8] sm:$0xff]  ;;  %v2429_v39 = vpack.c.bf16 %v1770_v30, %v1769_v29 }
  0x27   :  { %2446 = vmatpush3.bf16.msra.mxu1 %v2445_v49  ;;  %138 = vmatprep.mubr.f32.mxu0 %v2940_v52  ;;  %v1802_v34 = vld [vmem:[%s3602_s1 + $0x348] sm:$0xff]  ;;  %v3073_v38 = vld [vmem:[%s3603_s0 + $0x40] sm:$0xff]  ;;  %v1819_v40 = vld [vmem:[%s3602_s1 + $0x3d0] sm:$0xff]  ;;  %v2431_v47 = vpack.c.bf16 %v1788_v37, %v1787_v36 }
  0x28   :  { %276 = vmatprep.mubr.f32.mxu1 %v2940_v52  ;;  %2416 = vmatprep.subr.bf16.mxu0 %v2415_v53  ;;  %v1820_v41 = vld [vmem:[%s3602_s1 + $0x3d8] sm:$0xff]  ;;  %v2461_v42 = vpack.c.bf16 %v1802_v34, %v1801_v33  ;;  %v1771_v43 = vld [vmem:[%s3602_s1 + $0x250] sm:$0xff]  ;;  %v1789_v51 = vld [vmem:[%s3602_s1 + $0x2e0] sm:$0xff] }
  0x29   :  { %139 = vmatmul.mubr.f32.gmra.mrb[2].mxu0 %v2959_v59  ;;  %2448 = vmatprep.subr.bf16.mxu1 %v2447_v56  ;;  %v1772_v44 = vld [vmem:[%s3602_s1 + $0x258] sm:$0xff]  ;;  %v1803_v48 = vld [vmem:[%s3602_s1 + $0x350] sm:$0xff]  ;;  %v2463_v50 = vpack.c.bf16 %v1820_v41, %v1819_v40  ;;  %v1790_v53 = vld [vmem:[%s3602_s1 + $0x2e8] sm:$0xff] }
  0x2a   :  { %277 = vmatmul.mubr.f32.gmra.mrb[2].mxu1 %v2959_v59  ;;  %2418 = vmatpush3.bf16.msra.mxu0 %v2417_v60  ;;  %v3092_v46 = vld [vmem:[%s3603_s0 + $0x58] sm:$0xff]  ;;  %v3111_v54 = vld [vmem:[%s3603_s0 + $0x50] sm:$0xff]  ;;  %v2433_v55 = vpack.c.bf16 %v1772_v44, %v1771_v43  ;;  %v1821_v56 = vld [vmem:[%s3602_s1 + $0x3e0] sm:$0xff] }
  0x2b   :  { %2450 = vmatpush3.bf16.msra.mxu1 %v2449_v63  ;;  %143 = vmatprep.mubr.f32.mxu0 %v2978_v2  ;;  %v1804_v49 = vld [vmem:[%s3602_s1 + $0x358] sm:$0xff]  ;;  %v1822_v57 = vld [vmem:[%s3602_s1 + $0x3e8] sm:$0xff]  ;;  %v1773_v60 = vld [vmem:[%s3602_s1 + $0x260] sm:$0xff]  ;;  %v2435_v63 = vpack.c.bf16 %v1790_v53, %v1789_v51 }
  0x2c   :  { %281 = vmatprep.mubr.f32.mxu1 %v2978_v2  ;;  %2420 = vmatprep.subr.bf16.mxu0 %v2419_v3  ;;  %v2465_v58 = vpack.c.bf16 %v1804_v49, %v1803_v48  ;;  %v1774_v61 = vld [vmem:[%s3602_s1 + $0x268] sm:$0xff]  ;;  %v1805_v0 = vld [vmem:[%s3602_s1 + $0x360] sm:$0xff]  ;;  %v2467_v3 = vpack.c.bf16 %v1822_v57, %v1821_v56  ;;  %v1791_v4 = vld [vmem:[%s3602_s1 + $0x2f0] sm:$0xff] }
  0x2d   :  { %144 = vmatmul.mubr.f32.gmra.mrb[4].mxu0 %v2997_v9  ;;  %2452 = vmatprep.subr.bf16.mxu1 %v2451_v6  ;;  %v3130_v62 = vld [vmem:[%s3603_s0 + $0x68] sm:$0xff]  ;;  %v1792_v5 = vld [vmem:[%s3602_s1 + $0x2f8] sm:$0xff]  ;;  %v33_v6 = vld [vmem:[%s3603_s0 + $0x60] sm:$0xff]  ;;  %v2437_v7 = vpack.c.bf16 %v1774_v61, %v1773_v60 }
  0x2e   :  { %282 = vmatmul.mubr.f32.gmra.mrb[4].mxu1 %v2997_v9  ;;  %2422 = vmatpush3.bf16.msra.mxu0 %v2421_v10  ;;  %v1806_v1 = vld [vmem:[%s3602_s1 + $0x368] sm:$0xff]  ;;  %v1823_v8 = vld [vmem:[%s3602_s1 + $0x3f0] sm:$0xff]  ;;  %v1824_v10 = vld [vmem:[%s3602_s1 + $0x3f8] sm:$0xff]  ;;  %v2439_v15 = vpack.c.bf16 %v1792_v5, %v1791_v4 }
  0x2f   :  { %2454 = vmatpush3.bf16.msra.mxu1 %v2453_v13  ;;  %148 = vmatprep.mubr.f32.mxu0 %v3016_v17  ;;  %v2469_v11 = vpack.c.bf16 %v1806_v1, %v1805_v0  ;;  %v1775_v12 = vld [vmem:[%s3602_s1 + $0x270] sm:$0xff]  ;;  %v1776_v13 = vld [vmem:[%s3602_s1 + $0x278] sm:$0xff]  ;;  %v2471_v20 = vpack.c.bf16 %v1824_v10, %v1823_v8  ;;  %vm3463_vm3 = vmpackc.low %vm953_vm2, %vm953_vm2 }
  0x30   :  { %286 = vmatprep.mubr.f32.mxu1 %v3016_v17  ;;  %2424 = vmatprep.subr.bf16.mxu0 %v2423_v18  ;;  %v36_v14 = vld [vmem:[%s3603_s0 + $0x78] sm:$0xff]  ;;  %v1807_v18 = vld [vmem:[%s3602_s1 + $0x370] sm:$0xff]  ;;  %v2441_v22 = vpack.c.bf16 %v1776_v13, %v1775_v12 }
  0x31   :  { %149 = vmatmul.mubr.f32.gmra.mrb[6].mxu0 %v3035_v24  ;;  %2456 = vmatprep.subr.bf16.mxu1 %v2455_v21  ;;  %v1808_v19 = vld [vmem:[%s3602_s1 + $0x378] sm:$0xff]  ;;  %v35_v21 = vld [vmem:[%s3603_s0 + $0x70] sm:$0xff] }
  0x32   :  { %287 = vmatmul.mubr.f32.gmra.mrb[6].mxu1 %v3035_v24  ;;  %2426 = vmatpush3.bf16.msra.mxu0 %v2425_v25  ;;  %v2473_v23 = vpack.c.bf16 %v1808_v19, %v1807_v18 }
  0x33   :  { %2458 = vmatpush3.bf16.msra.mxu1 %v2457_v28  ;;  %153 = vmatprep.mubr.f32.mxu0 %v3054_v31 }
  0x34   :  { %291 = vmatprep.mubr.f32.mxu1 %v3054_v31  ;;  %2428 = vmatprep.subr.bf16.mxu0 %v2427_v32 }
  0x35   :  { %154 = vmatmul.mubr.f32.gmra.mrb[8].mxu0 %v3073_v38  ;;  %2460 = vmatprep.subr.bf16.mxu1 %v2459_v35 }
  0x36   :  { %292 = vmatmul.mubr.f32.gmra.mrb[8].mxu1 %v3073_v38  ;;  %2430 = vmatpush3.bf16.msra.mxu0 %v2429_v39 }
  0x37   :  { %2462 = vmatpush3.bf16.msra.mxu1 %v2461_v42  ;;  %158 = vmatprep.mubr.f32.mxu0 %v3092_v46 }
  0x38   :  { %296 = vmatprep.mubr.f32.mxu1 %v3092_v46  ;;  %2432 = vmatprep.subr.bf16.mxu0 %v2431_v47 }
  0x39   :  { %159 = vmatmul.mubr.f32.gmra.mrb[10].mxu0 %v3111_v54  ;;  %2464 = vmatprep.subr.bf16.mxu1 %v2463_v50 }
  0x3a   :  { %297 = vmatmul.mubr.f32.gmra.mrb[10].mxu1 %v3111_v54  ;;  %2434 = vmatpush3.bf16.msra.mxu0 %v2433_v55 }
  0x3b   :  { %2466 = vmatpush3.bf16.msra.mxu1 %v2465_v58  ;;  %163 = vmatprep.mubr.f32.mxu0 %v3130_v62 }
  0x3c   :  { %301 = vmatprep.mubr.f32.mxu1 %v3130_v62  ;;  %2436 = vmatprep.subr.bf16.mxu0 %v2435_v63 }
  0x3d   :  { %164 = vmatmul.mubr.f32.gmra.mrb[12].mxu0 %v33_v6  ;;  %2468 = vmatprep.subr.bf16.mxu1 %v2467_v3 }
  0x3e   :  { %302 = vmatmul.mubr.f32.gmra.mrb[12].mxu1 %v33_v6  ;;  %2438 = vmatpush3.bf16.msra.mxu0 %v2437_v7 }
  0x3f   :  { %2470 = vmatpush3.bf16.msra.mxu1 %v2469_v11  ;;  %168 = vmatprep.mubr.f32.mxu0 %v36_v14 }
  0x40   :  { %306 = vmatprep.mubr.f32.mxu1 %v36_v14  ;;  %2440 = vmatprep.subr.bf16.mxu0 %v2439_v15 }
  0x41   :  { %169 = vmatmul.mubr.f32.gmra.mrb[14].mxu0 %v35_v21  ;;  %2472 = vmatprep.subr.bf16.mxu1 %v2471_v20 }
  0x42   :  { %307 = vmatmul.mubr.f32.gmra.mrb[14].mxu1 %v35_v21  ;;  %2442 = vmatpush3.bf16.msra.mxu0 %v2441_v22 }
  0x43   :  { %2474 = vmatpush3.bf16.msra.mxu1 %v2473_v23  ;;  %417 = vmatprep.mubr.f32.mxu0 %v2859_v16 }
  0x44   :  { %563 = vmatprep.mubr.f32.mxu1 %v2859_v16  ;;  %v2657_v16 = vmov 0.0|0.0  }
  0x45   :  { %418 = vmatmul.mubr.f32.vlgmr.msra.gmra.mrb[16].mxu0 %v2923_v45  ;;  %2475 = vmatprep.subr.bf16.mxu0 %v2657_v16 }
  0x46   :  { %564 = vmatmul.mubr.f32.vlgmr.msra.gmra.mrb[16].mxu1 %v2923_v45  ;;  %422 = vmatprep.mubr.f32.mxu0 %v2940_v52  ;;  %v2659_v45 = vmov 0.0  }
  0x47   :  { %568 = vmatprep.mubr.f32.mxu1 %v2940_v52  ;;  %2551 = vmatprep.subr.bf16.mxu1 %v2657_v16 }
  0x49   :  { %423 = vmatmul.mubr.f32.gmra.mrb[18].mxu0 %v2959_v59 }
  0x4a   :  { %569 = vmatmul.mubr.f32.gmra.mrb[18].mxu1 %v2959_v59  ;;  %427 = vmatprep.mubr.f32.mxu0 %v2978_v2 }
  0x4b   :  { %573 = vmatprep.mubr.f32.mxu1 %v2978_v2 }
  0x4d   :  { %428 = vmatmul.mubr.f32.gmra.mrb[20].mxu0 %v2997_v9 }
  0x4e   :  { %574 = vmatmul.mubr.f32.gmra.mrb[20].mxu1 %v2997_v9  ;;  %432 = vmatprep.mubr.f32.mxu0 %v3016_v17 }
  0x4f   :  { %578 = vmatprep.mubr.f32.mxu1 %v3016_v17 }
  0x51   :  { %433 = vmatmul.mubr.f32.gmra.mrb[22].mxu0 %v3035_v24 }
  0x52   :  { %579 = vmatmul.mubr.f32.gmra.mrb[22].mxu1 %v3035_v24  ;;  %437 = vmatprep.mubr.f32.mxu0 %v3054_v31 }
  0x53   :  { %583 = vmatprep.mubr.f32.mxu1 %v3054_v31 }
  0x55   :  { %438 = vmatmul.mubr.f32.gmra.mrb[24].mxu0 %v3073_v38 }
  0x56   :  { %584 = vmatmul.mubr.f32.gmra.mrb[24].mxu1 %v3073_v38  ;;  %442 = vmatprep.mubr.f32.mxu0 %v3092_v46 }
  0x57   :  { %588 = vmatprep.mubr.f32.mxu1 %v3092_v46 }
  0x59   :  { %443 = vmatmul.mubr.f32.gmra.mrb[26].mxu0 %v3111_v54 }
  0x5a   :  { %589 = vmatmul.mubr.f32.gmra.mrb[26].mxu1 %v3111_v54  ;;  %447 = vmatprep.mubr.f32.mxu0 %v3130_v62 }
  0x5b   :  { %593 = vmatprep.mubr.f32.mxu1 %v3130_v62 }
  0x5d   :  { %448 = vmatmul.mubr.f32.gmra.mrb[28].mxu0 %v33_v6 }
  0x5e   :  { %594 = vmatmul.mubr.f32.gmra.mrb[28].mxu1 %v33_v6  ;;  %452 = vmatprep.mubr.f32.mxu0 %v36_v14 }
  0x5f   :  { %598 = vmatprep.mubr.f32.mxu1 %v36_v14 }
  0x61   :  { %453 = vmatmul.mubr.f32.gmra.mrb[30].mxu0 %v35_v21 }
  0x62   :  { %599 = vmatmul.mubr.f32.gmra.mrb[30].mxu1 %v35_v21  ;;  %2201 = vmatprep.mubr.msk.f32.mxu0 %vm2658_vm0, %v2659_v45 }
  0x63   :  { %2219 = vmatprep.mubr.msk.f32.mxu1 %vm2658_vm0, %v2659_v45 }
  0xf8   :  { %v1927_v52 = vpop.f32.mrb[0].mxu0 }
  0xf9   :  { %v1983_v59 = vpop.f32.mrb[0].mxu1  ;;  %v1928_v2 = vpop.f32.mrb[1].mxu0 }
  0xfa   :  { %v1929_v9 = vadd.f32 %v1928_v2, %v1927_v52  ;;  %v1984_v17 = vpop.f32.mrb[1].mxu1 }
  0xfb   :  { %v1985_v24 = vadd.f32 %v1984_v17, %v1983_v59 }
  0xfc   :  { %v1930_v25 = vpop.f32.mrb[2].mxu0 }
  0xfd   :  { %v312_v26 = vmax.f32 %v1929_v9, %v1985_v24  ;;  %v1986_v27 = vpop.f32.mrb[2].mxu1  ;;  %v1931_v28 = vpop.f32.mrb[3].mxu0 }
  0xfe   :  { %v1932_v29 = vadd.f32 %v1931_v28, %v1930_v25  ;;  %v1987_v30 = vpop.f32.mrb[3].mxu1 }
  0xff   :  { %v1988_v31 = vadd.f32 %v1987_v30, %v1986_v27 }
 0x100   :  { %v1933_v32 = vpop.f32.mrb[4].mxu0 }
 0x101   :  { %v313_v33 = vmax.f32 %v1932_v29, %v1988_v31  ;;  %v1989_v34 = vpop.f32.mrb[4].mxu1  ;;  %v1934_v35 = vpop.f32.mrb[5].mxu0 }
 0x102   :  { %v3207_v36 = vadd.f32 %v1934_v35, %v1933_v32  ;;  %v1990_v37 = vpop.f32.mrb[5].mxu1 }
 0x103   :  { %v1991_v38 = vadd.f32 %v1990_v37, %v1989_v34 }
 0x104   :  { %v1936_v39 = vpop.f32.mrb[6].mxu0 }
 0x105   :  { %v314_v40 = vmax.f32 %v3207_v36, %v1991_v38  ;;  %v1992_v41 = vpop.f32.mrb[6].mxu1  ;;  %v1937_v42 = vpop.f32.mrb[7].mxu0 }
 0x106   :  { %v3210_v43 = vadd.f32 %v1937_v42, %v1936_v39  ;;  %v1993_v44 = vpop.f32.mrb[7].mxu1 }
 0x107   :  { %v3212_v46 = vadd.f32 %v1993_v44, %v1992_v41 }
 0x108   :  { %v1939_v47 = vpop.f32.mrb[8].mxu0 }
 0x109   :  { %v315_v48 = vmax.f32 %v3210_v43, %v3212_v46  ;;  %v1995_v49 = vpop.f32.mrb[8].mxu1  ;;  %v1940_v50 = vpop.f32.mrb[9].mxu0 }
 0x10a   :  { %v3216_v51 = vadd.f32 %v1940_v50, %v1939_v47  ;;  %v1996_v53 = vpop.f32.mrb[9].mxu1 }
 0x10b   :  { %v3218_v54 = vadd.f32 %v1996_v53, %v1995_v49 }
 0x10c   :  { %v1942_v55 = vpop.f32.mrb[10].mxu0 }
 0x10d   :  { %v316_v56 = vmax.f32 %v3216_v51, %v3218_v54  ;;  %v1998_v57 = vpop.f32.mrb[10].mxu1  ;;  %v1943_v58 = vpop.f32.mrb[11].mxu0  ;;  %v3270_v51 = vld [vmem:[%s3604_s2 + $0x30] sm:$0xff] }
 0x10e   :  { %v3222_v60 = vadd.f32 %v1943_v58, %v1942_v55  ;;  %v1999_v61 = vpop.f32.mrb[11].mxu1 }
 0x10f   :  { %v3224_v62 = vadd.f32 %v1999_v61, %v1998_v57 }
 0x110   :  { %v1945_v63 = vpop.f32.mrb[12].mxu0 }
 0x111   :  { %v317_v0 = vmax.f32 %v3222_v60, %v3224_v62  ;;  %v2001_v1 = vpop.f32.mrb[12].mxu1  ;;  %v1946_v3 = vpop.f32.mrb[13].mxu0  ;;  %v613_v60 = vld [vmem:[%s3604_s2 + $0x8] sm:$0xff] }
 0x112   :  { %v3228_v4 = vadd.f32 %v1946_v3, %v1945_v63  ;;  %v2002_v5 = vpop.f32.mrb[13].mxu1 }
 0x113   :  { %v3230_v6 = vadd.f32 %v2002_v5, %v2001_v1 }
 0x114   :  { %v1948_v7 = vpop.f32.mrb[14].mxu0 }
 0x115   :  { %v318_v8 = vmax.f32 %v3228_v4, %v3230_v6  ;;  %v2004_v10 = vpop.f32.mrb[14].mxu1  ;;  %v1949_v11 = vpop.f32.mrb[15].mxu0 }
 0x116   :  { %v3234_v12 = vadd.f32 %v1949_v11, %v1948_v7  ;;  %v2005_v13 = vpop.f32.mrb[15].mxu1 }
 0x117   :  { %v3236_v14 = vadd.f32 %v2005_v13, %v2004_v10  ;;  %v3265_v10 = vld [vmem:[%s3604_s2] sm:$0xff] }
 0x118   :  { %v2039_v15 = vpop.f32.mrb[16].mxu0 }
 0x119   :  { %v319_v18 = vmax.f32 %v3234_v12, %v3236_v14  ;;  %v2040_v19 = vpop.f32.mrb[17].mxu0  ;;  %v2095_v20 = vpop.f32.mrb[16].mxu1 }
 0x11a   :  { %v2041_v21 = vadd.f32 %v2040_v19, %v2039_v15  ;;  %v2096_v22 = vpop.f32.mrb[17].mxu1 }
 0x11b   :  { %v2097_v23 = vadd.f32 %v2096_v22, %v2095_v20 }
 0x11c   :  { %v458_v52 = vmax.f32 %v312_v26, %v2041_v21  ;;  %v2042_v59 = vpop.f32.mrb[18].mxu0 }
 0x11d   :  { %v2043_v2 = vpop.f32.mrb[19].mxu0  ;;  %v2098_v9 = vpop.f32.mrb[18].mxu1 }
 0x11e   :  { %v3240_v17 = vmax.f32 %v458_v52, %v2097_v23  ;;  %v2044_v24 = vadd.f32 %v2043_v2, %v2042_v59  ;;  %v2099_v25 = vpop.f32.mrb[19].mxu1 }
 0x11f   :  { %v2100_v27 = vadd.f32 %v2099_v25, %v2098_v9  ;;  %v614_v25 = vld [vmem:[%s3604_s2 + $0x10] sm:$0xff] }
 0x120   :  { %v459_v28 = vmax.f32 %v313_v33, %v2044_v24  ;;  %v2045_v29 = vpop.f32.mrb[20].mxu0 }
 0x121   :  { %v2046_v30 = vpop.f32.mrb[21].mxu0  ;;  %v2101_v31 = vpop.f32.mrb[20].mxu1 }
 0x122   :  { %v3242_v32 = vmax.f32 %v459_v28, %v2100_v27  ;;  %v2047_v34 = vadd.f32 %v2046_v30, %v2045_v29  ;;  %v2102_v35 = vpop.f32.mrb[21].mxu1 }
 0x123   :  { %v2103_v36 = vadd.f32 %v2102_v35, %v2101_v31 }
 0x124   :  { %v2476_v26 = vpack.c.bf16 %v3242_v32, %v3240_v17  ;;  %v460_v37 = vmax.f32 %v314_v40, %v2047_v34  ;;  %v2048_v38 = vpop.f32.mrb[22].mxu0 }
 0x125   :  { %v2049_v39 = vpop.f32.mrb[23].mxu0  ;;  %v2104_v41 = vpop.f32.mrb[22].mxu1 }
 0x126   :  { %v3246_v42 = vmax.f32 %v460_v37, %v2103_v36  ;;  %v2050_v44 = vadd.f32 %v2049_v39, %v2048_v38  ;;  %2477 = vmatpush3.bf16.msra.mxu0 %v2476_v26  ;;  %2553 = vmatpush3.bf16.msra.mxu1 %v2476_v26  ;;  %v2105_v33 = vpop.f32.mrb[23].mxu1  ;;  %v617_v39 = vld [vmem:[%s3604_s2 + $0x28] sm:$0xff] }
 0x127   :  { %v2106_v47 = vadd.f32 %v2105_v33, %v2104_v41  ;;  %2478 = vmatprep.subr.bf16.mxu0 %v2657_v16  ;;  %2552 = vmatprep.subr.bf16.mxu1 %v2657_v16 }
 0x128   :  { %v461_v49 = vmax.f32 %v315_v48, %v2050_v44  ;;  %v2051_v50 = vpop.f32.mrb[24].mxu0 }
 0x129   :  { %v2052_v40 = vpop.f32.mrb[25].mxu0  ;;  %v2107_v53 = vpop.f32.mrb[24].mxu1 }
 0x12a   :  { %v3253_v55 = vmax.f32 %v461_v49, %v2106_v47  ;;  %v2053_v57 = vadd.f32 %v2052_v40, %v2051_v50  ;;  %v2108_v58 = vpop.f32.mrb[25].mxu1 }
 0x12b   :  { %v2109_v61 = vadd.f32 %v2108_v58, %v2107_v53 }
 0x12c   :  { %v2479_v63 = vpack.c.bf16 %v3253_v55, %v3246_v42  ;;  %v462_v1 = vmax.f32 %v316_v56, %v2053_v57  ;;  %v2054_v3 = vpop.f32.mrb[26].mxu0 }
 0x12d   :  { %v2055_v5 = vpop.f32.mrb[27].mxu0  ;;  %v2110_v7 = vpop.f32.mrb[26].mxu1 }
 0x12e   :  { %v3260_v43 = vmax.f32 %v462_v1, %v2109_v61  ;;  %v2056_v46 = vadd.f32 %v2055_v5, %v2054_v3  ;;  %2480 = vmatpush3.bf16.msra.mxu0 %v2479_v63  ;;  %2554 = vmatpush3.bf16.msra.mxu1 %v2479_v63  ;;  %v2111_v48 = vpop.f32.mrb[27].mxu1  ;;  %v820_v1 = vlaneseq }
 0x12f   :  { %v2112_v54 = vadd.f32 %v2111_v48, %v2110_v7  ;;  %2482 = vmatprep.subr.bf16.mxu1 %v2476_v26  ;;  %2513 = vmatprep.subr.bf16.mxu0 %v2657_v16 }
 0x130   :  { %v463_v56 = vmax.f32 %v317_v0, %v2056_v46  ;;  %v2057_v11 = vpop.f32.mrb[28].mxu0  ;;  %v3386_v3 = vshrl.u32 %v820_v1, 7 }
 0x131   :  { %v2058_v13 = vpop.f32.mrb[29].mxu0  ;;  %2202 = vmatmul.mubr.msk.f32.vlgmr.msra.gmra.mrb[32].mxu0 %vm626_vm1, %v3265_v10  ;;  %v2113_v15 = vpop.f32.mrb[28].mxu1  ;;  %2220 = vmatmul.mubr.msk.f32.vlgmr.msra.gmra.mrb[32].mxu1 %vm626_vm1, %v3270_v51 }
 0x132   :  { %v3280_v19 = vmax.f32 %v463_v56, %v2112_v54  ;;  %v2059_v20 = vadd.f32 %v2058_v13, %v2057_v11  ;;  %2484 = vmatpush3.bf16.msra.mxu1 %v2476_v26  ;;  %v2114_v21 = vpop.f32.mrb[29].mxu1  ;;  %2204 = vmatprep.mubr.msk.f32.mxu0 %vm2658_vm0, %v2659_v45  ;;  %v616_v26 = vld [vmem:[%s3604_s2 + $0x20] sm:$0xff]  ;;  %v822_v5 = vsub.s32 0, %v3386_v3 }
 0x133   :  { %v2115_v62 = vadd.f32 %v2114_v21, %v2113_v15  ;;  %2486 = vmatprep.subr.bf16.mxu1 %v2479_v63  ;;  %2222 = vmatprep.mubr.msk.f32.mxu1 %vm2658_vm0, %v2659_v45 }
 0x134   :  { %v3291_v0 = vpack.c.bf16 %v3280_v19, %v3260_v43  ;;  %v464_v22 = vmax.f32 %v318_v8, %v2059_v20  ;;  %v2060_v23 = vpop.f32.mrb[30].mxu0  ;;  %v615_v8 = vld [vmem:[%s3604_s2 + $0x18] sm:$0xff] }
 0x135   :  { %v2061_v52 = vpop.f32.mrb[31].mxu0  ;;  %2205 = vmatmul.mubr.msk.f32.gmra.mrb[34].mxu0 %vm626_vm1, %v613_v60  ;;  %v2116_v59 = vpop.f32.mrb[30].mxu1 }
 0x136   :  { %v3297_v2 = vmax.f32 %v464_v22, %v2115_v62  ;;  %v2062_v9 = vadd.f32 %v2061_v52, %v2060_v23  ;;  %2488 = vmatpush3.bf16.msra.mxu1 %v2479_v63  ;;  %2515 = vmatpush3.bf16.msra.mxu0 %v3291_v0  ;;  %v2117_v24 = vpop.f32.mrb[31].mxu1  ;;  %v2660_v63 = vmov 0  }
 0x137   :  { %v2118_v27 = vadd.f32 %v2117_v24, %v2116_v59  ;;  %2207 = vmatprep.mubr.msk.f32.mxu0 %vm2658_vm0, %v2659_v45  ;;  %2516 = vmatprep.subr.bf16.mxu0 %v2657_v16  ;;  %v619_v16 = vld [vmem:[%s3604_s2 + $0x38] sm:$0xff] }
 0x138   :  { %v465_v4 = vmax.f32 %v319_v18, %v2062_v9  ;;  %2223 = vmatmul.mubr.msk.f32.gmra.mrb[34].mxu1 %vm626_vm1, %v619_v16  ;;  %v620_v18 = vld [vmem:[%s3604_s2 + $0x40] sm:$0x1]  ;;  %2559 = vset.pattern.permute.xlu1 %v2660_v63 }
 0x139   :  { %2208 = vmatmul.mubr.msk.f32.gmra.mrb[36].mxu0 %vm626_vm1, %v614_v25  ;;  %2225 = vmatprep.mubr.msk.f32.mxu1 %vm2658_vm0, %v2659_v45 }
 0x13a   :  { %v3310_v6 = vmax.f32 %v465_v4, %v2118_v27  ;;  %2210 = vmatprep.mubr.msk.f32.mxu0 %vm2658_vm0, %v2659_v45 }
 0x13c   :  { %v3319_v28 = vpack.c.bf16 %v3310_v6, %v3297_v2  ;;  %2226 = vmatmul.mubr.msk.f32.gmra.mrb[36].mxu1 %vm626_vm1, %v620_v18 }
 0x13d   :  { %2211 = vmatmul.mubr.msk.f32.gmra.mrb[38].mxu0 %vm626_vm1, %v615_v8 }
 0x13e   :  { %2518 = vmatpush3.bf16.msra.mxu0 %v3319_v28  ;;  %2213 = vmatprep.mubr.msk.f32.mxu0 %vm2658_vm0, %v2659_v45 }
 0x141   :  { %2214 = vmatmul.mubr.msk.f32.gmra.mrb[40].mxu0 %vm626_vm1, %v616_v26 }
 0x142   :  { %2216 = vmatprep.mubr.msk.f32.mxu0 %vm2658_vm0, %v2659_v45 }
 0x145   :  { %2217 = vmatmul.mubr.msk.f32.gmra.mrb[42].mxu0 %vm626_vm1, %v617_v39 }
 0x146   :  { %2278 = vmatprep.mubr.msk.f32.mxu0 %vm2658_vm0, %v2659_v45 }
 0x149   :  { %2279 = vmatmul.mubr.msk.f32.vlgmr.msra.gmra.mrb[44].mxu0 %vm626_vm1, %v3265_v10 }
 0x14a   :  { %2281 = vmatprep.mubr.msk.f32.mxu0 %vm2658_vm0, %v2659_v45 }
 0x14d   :  { %2282 = vmatmul.mubr.msk.f32.gmra.mrb[46].mxu0 %vm626_vm1, %v613_v60 }
 0x14e   :  { %2284 = vmatprep.mubr.msk.f32.mxu0 %vm2658_vm0, %v2659_v45 }
 0x151   :  { %2285 = vmatmul.mubr.msk.f32.gmra.mrb[48].mxu0 %vm626_vm1, %v614_v25 }
 0x152   :  { %2287 = vmatprep.mubr.msk.f32.mxu0 %vm2658_vm0, %v2659_v45 }
 0x155   :  { %2288 = vmatmul.mubr.msk.f32.gmra.mrb[50].mxu0 %vm626_vm1, %v615_v8 }
 0x156   :  { %2290 = vmatprep.mubr.msk.f32.mxu0 %vm2658_vm0, %v2659_v45 }
 0x159   :  { %2291 = vmatmul.mubr.msk.f32.gmra.mrb[52].mxu0 %vm626_vm1, %v616_v26 }
 0x15a   :  { %2293 = vmatprep.mubr.msk.f32.mxu0 %vm2658_vm0, %v2659_v45 }
 0x15d   :  { %2294 = vmatmul.mubr.msk.f32.gmra.mrb[54].mxu0 %vm626_vm1, %v617_v39 }
 0x15e   :  { %2296 = vmatprep.mubr.msk.f32.mxu0 %vm2658_vm0, %v2659_v45 }
 0x161   :  { %2297 = vmatmul.mubr.msk.f32.gmra.mrb[56].mxu0 %vm626_vm1, %v3270_v51 }
 0x162   :  { %2299 = vmatprep.mubr.msk.f32.mxu0 %vm2658_vm0, %v2659_v45 }
 0x165   :  { %2300 = vmatmul.mubr.msk.f32.gmra.mrb[58].mxu0 %vm626_vm1, %v619_v16 }
 0x166   :  { %2302 = vmatprep.mubr.msk.f32.mxu0 %vm2658_vm0, %v2659_v45 }
 0x169   :  { %2303 = vmatmul.mubr.msk.f32.gmra.mrb[60].mxu0 %vm626_vm1, %v620_v18 }
 0x204   :  { %v720_v12 = vpop.f32.mrb[32].mxu0  ;;  %v3338_v37 = vpop.f32.mrb[32].mxu1 }
 0x205   :  { %788 = vxpose.xlu0.b32.start [1/4] (short) (narrow) %v720_v12, 64  ;;  %v2203_v14 = vpop.f32.mrb[33].mxu0  ;;  %v2221_v38 = vpop.f32.mrb[33].mxu1 }
 0x208   :  { %v725_v29 = vpop.f32.mrb[34].mxu0 }
 0x209   :  { %789 = vxpose.xlu0.b32.cont [2/4] (short) (narrow) %v725_v29, 64  ;;  %v2206_v30 = vpop.f32.mrb[35].mxu0 }
 0x20b   :  { %v3376_v41 = vpop.f32.mrb[34].mxu1 }
 0x20c   :  { %v730_v31 = vpop.f32.mrb[36].mxu0  ;;  %v2224_v44 = vpop.f32.mrb[35].mxu1 }
 0x20d   :  { %790 = vxpose.xlu0.b32.cont [3/4] (short) (narrow) %v730_v31, 64  ;;  %v2209_v34 = vpop.f32.mrb[37].mxu0 }
 0x20e   :  { %v621_v34 = vld [vmem:[%s3605_s3] sm:$0xff] }
 0x20f   :  { %v760_v58 = vpop.f32.mrb[36].mxu1 }
 0x210   :  { %v735_v35 = vpop.f32.mrb[38].mxu0  ;;  %v2227_v61 = vpop.f32.mrb[37].mxu1  ;;  %v823_v7 = vrot.slane %v760_v58, %v822_v5 }
 0x211   :  { %791 = vxpose.xlu0.b32.end [4/4] (short) (narrow) %v735_v35, 64  ;;  %v2212_v36 = vpop.f32.mrb[39].mxu0 }
 0x214   :  { %v740_v8 = vpop.f32.mrb[40].mxu0 }
 0x215   :  { %v2215_v16 = vpop.f32.mrb[41].mxu0 }
 0x218   :  { %v3407_v12 = vpop.f32.mrb[42].mxu0 }
 0x219   :  { %v2218_v14 = vpop.f32.mrb[43].mxu0 }
 0x21c   :  { %v3409_v18 = vpop.f32.mrb[44].mxu0 }
 0x21d   :  { %v2280_v29 = vpop.f32.mrb[45].mxu0 }
 0x220   :  { %v3411_v30 = vpop.f32.mrb[46].mxu0 }
 0x221   :  { %v2283_v31 = vpop.f32.mrb[47].mxu0 }
 0x224   :  { %v3416_v35 = vpop.f32.mrb[48].mxu0 }
 0x225   :  { %v2286_v36 = vpop.f32.mrb[49].mxu0 }
 0x228   :  { %v3418_v26 = vpop.f32.mrb[50].mxu0 }
 0x229   :  { %v2289_v38 = vpop.f32.mrb[51].mxu0 }
 0x22c   :  { %v1286_v39 = vpop.f32.mrb[52].mxu0 }
 0x22d   :  { %v2292_v44 = vpop.f32.mrb[53].mxu0 }
 0x23a   :  { %2560 = vset.pattern.permute.xlu0 %v2660_v63 }
 0x285   :  { %v804_v33 = vpop.trf.xlu0 }
 0x286   :  { %2236 = vmatprep.mubr.msk.f32.mxu1 %vm626_vm1, %v804_v33  ;;  %v622_v33 = vld [vmem:[%s3605_s3 + $0x8] sm:$0xff] }
 0x289   :  { %v805_v47 = vpop.trf.xlu0 }
 0x28a   :  { %2237 = vmatmul.mubr.msk.f32.vlgmr.msra.gmra.mrb[38].mxu1 %vm626_vm1, %v805_v47 }
 0x28d   :  { %v806_v49 = vpop.trf.xlu0 }
 0x28e   :  { %2239 = vmatprep.mubr.msk.f32.mxu1 %vm626_vm1, %v806_v49 }
 0x291   :  { %v807_v50 = vpop.trf.xlu0 }
 0x292   :  { %2240 = vmatmul.mubr.msk.f32.gmra.mrb[40].mxu1 %vm626_vm1, %v807_v50  ;;  %v623_v50 = vld [vmem:[%s3605_s3 + $0x10] sm:$0xff] }
 0x295   :  { %v808_v40 = vpop.trf.xlu0 }
 0x296   :  { %2242 = vmatprep.mubr.msk.f32.mxu1 %vm626_vm1, %v808_v40  ;;  %v3430_v40 = vpop.f32.mrb[54].mxu0 }
 0x299   :  { %v809_v45 = vpop.trf.xlu0 }
 0x29a   :  { %2243 = vmatmul.mubr.msk.f32.gmra.mrb[42].mxu1 %vm626_vm1, %v809_v45  ;;  %v2295_v45 = vpop.f32.mrb[55].mxu0 }
 0x29d   :  { %v810_v53 = vpop.trf.xlu0 }
 0x29e   :  { %2245 = vmatprep.mubr.msk.f32.mxu1 %vm626_vm1, %v810_v53  ;;  %v3432_v53 = vpop.f32.mrb[56].mxu0 }
 0x2a1   :  { %v811_v57 = vpop.trf.xlu0 }
 0x2a2   :  { %2246 = vmatmul.mubr.msk.f32.gmra.mrb[44].mxu1 %vm626_vm1, %v811_v57  ;;  %v2298_v57 = vpop.f32.mrb[57].mxu0 }
 0x35d   :  { %v2238_v46 = vpop.f32.mrb[38].mxu1 }
 0x35e   :  { %v920_v48 = vadd.f32 %v2238_v46, %v823_v7  ;;  %v914_v10 = vpop.f32.mrb[39].mxu1 }
 0x35f   :  { %v915_v51 = vadd.f32 %v914_v10, %v823_v7 }
 0x360   :  { %v957_v54 = vsel %vm953_vm2, %v920_v48, -inf }
 0x361   :  { %958 = vmax.xlane.f32.xlu1 %v957_v54  ;;  %v954_v56 = vsel %vm953_vm2, %v915_v51, -inf }
 0x365   :  { %955 = vmax.xlane.f32.xlu1 %v954_v56  ;;  %v2241_v11 = vpop.f32.mrb[40].mxu1 }
 0x366   :  { %v930_v13 = vadd.f32 %v2241_v11, %v823_v7  ;;  %v924_v15 = vpop.f32.mrb[41].mxu1 }
 0x367   :  { %v925_v20 = vadd.f32 %v924_v15, %v823_v7 }
 0x368   :  { %v963_v21 = vsel %vm953_vm2, %v930_v13, -inf }
 0x369   :  { %964 = vmax.xlane.f32.xlu1 %v963_v21  ;;  %v960_v60 = vsel %vm953_vm2, %v925_v20, -inf }
 0x36d   :  { %961 = vmax.xlane.f32.xlu1 %v960_v60  ;;  %v2244_v62 = vpop.f32.mrb[42].mxu1 }
 0x36e   :  { %v3395_v22 = vadd.f32 %v2244_v62, %v823_v7  ;;  %v934_v23 = vpop.f32.mrb[43].mxu1 }
 0x36f   :  { %v3397_v52 = vadd.f32 %v934_v23, %v823_v7 }
 0x370   :  { %v969_v59 = vsel %vm953_vm2, %v3395_v22, -inf }
 0x371   :  { %970 = vmax.xlane.f32.xlu1 %v969_v59  ;;  %v966_v9 = vsel %vm953_vm2, %v3397_v52, -inf }
 0x372   :  { %967 = vmax.xlane.f32.xlu0 %v966_v9 }
 0x375   :  { %v2247_v24 = vpop.f32.mrb[44].mxu1 }
 0x376   :  { %v3403_v25 = vadd.f32 %v2247_v24, %v823_v7  ;;  %v944_v27 = vpop.f32.mrb[45].mxu1 }
 0x377   :  { %v3405_v4 = vadd.f32 %v944_v27, %v823_v7 }
 0x378   :  { %v975_v47 = vsel %vm953_vm2, %v3403_v25, -inf }
 0x379   :  { %v972_v49 = vsel %vm953_vm2, %v3405_v4, -inf }
 0x382   :  { %766 = vperm.xlu1 %2559, %v621_v34  }
 0x388   :  { %771 = vperm.xlu0 %2560, %v622_v33  }
 0x3a6   :  { %976 = vmax.xlane.f32.xlu1 %v975_v47 }
 0x3aa   :  { %973 = vmax.xlane.f32.xlu1 %v972_v49 }
 0x3bb   :  { %776 = vperm.xlu1 %2559, %v623_v50  }
 0x3ee   :  { %v959_v58 = vpop.xlane.xlu1 %958 }
 0x3ef   :  { %v979_v61 = vsub.f32 %v920_v48, %v959_v58 }
 0x3f1   :  { %v988_v63 = vmul.f32 1.442695, %v979_v61 }
 0x3f2   :  { %v956_v1 = vpop.xlane.xlu1 %955 }
 0x3f3   :  { %2561 = vpow2.f32 %v988_v63  ;;  %v978_v7 = vsub.f32 %v915_v51, %v956_v1  ;;  %v624_v63 = vld [vmem:[%s3605_s3 + $0x18] sm:$0xff] }
 0x3f5   :  { %v986_v46 = vmul.f32 1.442695, %v978_v7 }
 0x3f6   :  { %v965_v10 = vpop.xlane.xlu1 %964 }
 0x3f7   :  { %2563 = vpow2.f32 %v986_v46  ;;  %v981_v54 = vsub.f32 %v930_v13, %v965_v10 }
 0x3f9   :  { %v992_v56 = vmul.f32 1.442695, %v981_v54 }
 0x3fa   :  { %v962_v11 = vpop.xlane.xlu1 %961 }
 0x3fb   :  { %2565 = vpow2.f32 %v992_v56  ;;  %v980_v15 = vsub.f32 %v925_v20, %v962_v11 }
 0x3fd   :  { %v3434_v21 = vpop.eup %2561  ;;  %v990_v60 = vmul.f32 1.442695, %v980_v15 }
 0x3fe   :  { %v971_v62 = vpop.xlane.xlu1 %970  ;;  %v1005_v23 = vsel %vm953_vm2, %v3434_v21, 0.0 }
 0x3ff   :  { %2567 = vpow2.f32 %v990_v60  ;;  %v983_v48 = vsub.f32 %v3395_v22, %v971_v62  ;;  %1006 = vadd.xlane.f32.xlu1 %v1005_v23  ;;  %v968_v51 = vpop.xlane.xlu0 %967 }
 0x400   :  { %v982_v59 = vsub.f32 %v3397_v52, %v968_v51 }
 0x401   :  { %v2564_v9 = vpop.eup %2563  ;;  %v996_v13 = vmul.f32 1.442695, %v983_v48 }
 0x402   :  { %v994_v24 = vmul.f32 1.442695, %v982_v59  ;;  %v1002_v27 = vsel %vm953_vm2, %v2564_v9, 0.0  ;;  %v767_v20 = vpop.permute.xlu1 %766 }
 0x403   :  { %2569 = vpow2.f32 %v996_v13  ;;  %1003 = vadd.xlane.f32.xlu1 %v1002_v27  ;;  %v784_v16 = vadd.f32 %v767_v20, %v740_v8  ;;  %v1310_v14 = vadd.f32 %v1286_v39, %v767_v20 }
 0x404   :  { %2571 = vpow2.f32 %v994_v24 }
 0x405   :  { %v2566_v29 = vpop.eup %2565  ;;  %2264 = vmatprep.mubr.msk.f32.mxu1 %vm953_vm2, %v784_v16  ;;  %2341 = vmatprep.mubr.msk.f32.mxu0 %vm953_vm2, %v1310_v14 }
 0x406   :  { %v1011_v22 = vsel %vm953_vm2, %v2566_v29, 0.0 }
 0x407   :  { %1012 = vadd.xlane.f32.xlu1 %v1011_v22 }
 0x409   :  { %v2568_v52 = vpop.eup %2567 }
 0x40a   :  { %v1008_v31 = vsel %vm953_vm2, %v2568_v52, 0.0 }
 0x40b   :  { %1009 = vadd.xlane.f32.xlu1 %v1008_v31 }
 0x40d   :  { %v2570_v34 = vpop.eup %2569 }
 0x40e   :  { %v1017_v36 = vsel %vm953_vm2, %v2570_v34, 0.0  ;;  %v2572_v38 = vpop.eup %2571 }
 0x40f   :  { %1018 = vadd.xlane.f32.xlu1 %v1017_v36  ;;  %v1014_v8 = vsel %vm953_vm2, %v2572_v38, 0.0 }
 0x413   :  { %1015 = vadd.xlane.f32.xlu1 %v1014_v8 }
 0x433   :  { %v977_v39 = vpop.xlane.xlu1 %976 }
 0x434   :  { %v985_v44 = vsub.f32 %v3403_v25, %v977_v39  ;;  %v1301_v25 = vpop.f32.mrb[58].mxu0 }
 0x435   :  { %v2301_v1 = vpop.f32.mrb[59].mxu0 }
 0x436   :  { %v1000_v33 = vmul.f32 1.442695, %v985_v44 }
 0x437   :  { %v974_v47 = vpop.xlane.xlu1 %973 }
 0x438   :  { %2573 = vpow2.f32 %v1000_v33  ;;  %v984_v49 = vsub.f32 %v3405_v4, %v974_v47 }
 0x43a   :  { %v998_v50 = vmul.f32 1.442695, %v984_v49 }
 0x43b   :  { %v3456_v4 = vpop.permute.xlu1 %776 }
 0x43c   :  { %2575 = vpow2.f32 %v998_v50  ;;  %v786_v39 = vadd.f32 %v3456_v4, %v3338_v37  ;;  %v1306_v50 = vpop.f32.mrb[60].mxu0 }
 0x442   :  { %v2574_v45 = vpop.eup %2573 }
 0x443   :  { %v1023_v57 = vsel %vm953_vm2, %v2574_v45, 0.0 }
 0x444   :  { %1024 = vadd.xlane.f32.xlu1 %v1023_v57  ;;  %v3510_v57 = vstv %s3606_s4 }
 0x446   :  { %v2576_v58 = vpop.eup %2575 }
 0x447   :  { %v1020_v61 = vsel %vm953_vm2, %v2576_v58, 0.0 }
 0x448   :  { %1021 = vadd.xlane.f32.xlu1 %v1020_v61 }
 0x459   :  { %781 = vperm.xlu1 %2559, %v624_v63  }
 0x482   :  { %1314 = vxpose.xlu1.b32.start [1/4] (short) (narrow) %v3409_v18, 64 }
 0x486   :  { %1315 = vxpose.xlu1.b32.cont [2/4] (short) (narrow) %v3411_v30, 64 }
 0x48a   :  { %1316 = vxpose.xlu1.b32.cont [3/4] (short) (narrow) %v3416_v35, 64 }
 0x48c   :  { %v1007_v7 = vpop.xlane.xlu1 %1006 }
 0x48d   :  { %2577 = vrcp.f32 %v1007_v7 }
 0x48e   :  { %1317 = vxpose.xlu1.b32.end [4/4] (short) (narrow) %v3418_v26, 64 }
 0x490   :  { %v1004_v46 = vpop.xlane.xlu1 %1003 }
 0x491   :  { %2579 = vrcp.f32 %v1004_v46 }
 0x494   :  { %v1013_v10 = vpop.xlane.xlu1 %1012 }
 0x495   :  { %2581 = vrcp.f32 %v1013_v10 }
 0x497   :  { %v2578_v56 = vpop.eup %2577 }
 0x498   :  { %v1010_v54 = vpop.xlane.xlu1 %1009  ;;  %v1035_v30 = vmul.f32 %v2578_v56, %v3434_v21 }
 0x499   :  { %2583 = vrcp.f32 %v1010_v54 }
 0x49b   :  { %v2580_v11 = vpop.eup %2579 }
 0x49c   :  { %v1019_v15 = vpop.xlane.xlu1 %1018  ;;  %v1034_v18 = vmul.f32 %v2580_v11, %v2564_v9 }
 0x49d   :  { %2585 = vrcp.f32 %v1019_v15 }
 0x49e   :  { %v2489_v26 = vpack.c.bf16 %v1035_v30, %v1034_v18 }
 0x49f   :  { %v2582_v62 = vpop.eup %2581 }
 0x4a0   :  { %2491 = vmatprep.subr.msk.bf16.mxu1 %vm3463_vm3, %v2489_v26  ;;  %v1016_v60 = vpop.xlane.xlu1 %1015  ;;  %v1037_v21 = vmul.f32 %v2582_v62, %v2566_v29 }
 0x4a1   :  { %2587 = vrcp.f32 %v1016_v60  ;;  %2494 = vmatpush3.bf16.xpose.msk.msra.mxu1 %vm3463_vm3, %v2489_v26 }
 0x4a3   :  { %v2584_v23 = vpop.eup %2583 }
 0x4a4   :  { %v1036_v48 = vmul.f32 %v2584_v23, %v2568_v52 }
 0x4a6   :  { %v2495_v51 = vpack.c.bf16 %v1037_v21, %v1036_v48 }
 0x4a7   :  { %v2586_v59 = vpop.eup %2585 }
 0x4a8   :  { %2497 = vmatprep.subr.msk.bf16.mxu1 %vm3463_vm3, %v2495_v51  ;;  %v1039_v24 = vmul.f32 %v2586_v59, %v2570_v34  ;;  %v3486_v34 = vpop.permute.xlu0 %771 }
 0x4a9   :  { %2500 = vmatpush3.bf16.xpose.msk.msra.mxu1 %vm3463_vm3, %v2495_v51  ;;  %v785_v8 = vadd.f32 %v3486_v34, %v3407_v12 }
 0x4ab   :  { %v2588_v9 = vpop.eup %2587 }
 0x4ac   :  { %v1038_v13 = vmul.f32 %v2588_v9, %v2572_v38 }
 0x4ae   :  { %v2501_v27 = vpack.c.bf16 %v1039_v24, %v1038_v13 }
 0x4b0   :  { %2503 = vmatprep.subr.msk.bf16.mxu1 %vm3463_vm3, %v2501_v27 }
 0x4b1   :  { %2506 = vmatpush3.bf16.xpose.msk.msra.mxu1 %vm3463_vm3, %v2501_v27 }
 0x4d1   :  { %v1025_v20 = vpop.xlane.xlu1 %1024 }
 0x4d2   :  { %2589 = vrcp.f32 %v1025_v20 }
 0x4d5   :  { %v1022_v16 = vpop.xlane.xlu1 %1021 }
 0x4d6   :  { %2591 = vrcp.f32 %v1022_v16 }
 0x4d9   :  { %v782_v14 = vpop.permute.xlu1 %781 }
 0x4da   :  { %v3479_v29 = vadd.f32 %v1301_v25, %v782_v14  ;;  %v787_v44 = vadd.f32 %v782_v14, %v3376_v41 }
 0x4dc   :  { %v2590_v22 = vpop.eup %2589 }
 0x4dd   :  { %v1041_v36 = vmul.f32 %v2590_v22, %v2574_v45  ;;  %v2304_v45 = vpop.f32.mrb[61].mxu0 }
 0x4e0   :  { %v2592_v52 = vpop.eup %2591 }
 0x4e1   :  { %v1040_v31 = vmul.f32 %v2592_v52, %v2576_v58 }
 0x4e3   :  { %v2507_v38 = vpack.c.bf16 %v1041_v36, %v1040_v31 }
 0x4e5   :  { %2509 = vmatprep.subr.msk.bf16.mxu1 %vm3463_vm3, %v2507_v38 }
 0x4e6   :  { %2512 = vmatpush3.bf16.xpose.msk.msra.mxu1 %vm3463_vm3, %v2507_v38 }
 0x4e7   :  { %2520 = vmatprep.subr.bf16.mxu1 %v3291_v0 }
 0x4ed   :  { %2265 = vmatmul.mubr.msk.f32.vlgmr.msra.gmra.mrb[46].mxu1 %vm953_vm2, %v785_v8 }
 0x4ee   :  { %2267 = vmatprep.mubr.msk.f32.mxu1 %vm953_vm2, %v786_v39  ;;  %2522 = vmatpush3.bf16.msra.mxu1 %v3291_v0 }
 0x4ef   :  { %2524 = vmatprep.subr.bf16.mxu1 %v3319_v28 }
 0x4f1   :  { %2268 = vmatmul.mubr.msk.f32.gmra.mrb[48].mxu1 %vm953_vm2, %v787_v44 }
 0x4f2   :  { %2526 = vmatpush3.bf16.msra.mxu1 %v3319_v28 }
 0x502   :  { %v1330_v33 = vpop.trf.xlu1 }
 0x503   :  { %2313 = vmatprep.mubr.msk.f32.mxu1 %vm626_vm1, %v1330_v33 }
 0x506   :  { %v1331_v12 = vpop.trf.xlu1 }
 0x507   :  { %2314 = vmatmul.mubr.msk.f32.vlgmr.msra.gmra.mrb[50].mxu1 %vm626_vm1, %v1331_v12 }
 0x50a   :  { %v1332_v37 = vpop.trf.xlu1 }
 0x50b   :  { %2316 = vmatprep.mubr.msk.f32.mxu1 %vm626_vm1, %v1332_v37 }
 0x50e   :  { %v1333_v47 = vpop.trf.xlu1 }
 0x50f   :  { %2317 = vmatmul.mubr.msk.f32.gmra.mrb[52].mxu1 %vm626_vm1, %v1333_v47 }
 0x512   :  { %v1334_v0 = vpop.trf.xlu1 }
 0x513   :  { %2319 = vmatprep.mubr.msk.f32.mxu1 %vm626_vm1, %v1334_v0 }
 0x516   :  { %v1335_v41 = vpop.trf.xlu1 }
 0x517   :  { %2320 = vmatmul.mubr.msk.f32.gmra.mrb[54].mxu1 %vm626_vm1, %v1335_v41 }
 0x51a   :  { %v1336_v49 = vpop.trf.xlu1 }
 0x51b   :  { %2322 = vmatprep.mubr.msk.f32.mxu1 %vm626_vm1, %v1336_v49 }
 0x51e   :  { %v1337_v28 = vpop.trf.xlu1 }
 0x51f   :  { %2323 = vmatmul.mubr.msk.f32.gmra.mrb[56].mxu1 %vm626_vm1, %v1337_v28 }
 0x5c0   :  { %v2266_v58 = vpop.f32.mrb[46].mxu1 }
 0x5c1   :  { %v1165_v61 = vmul.f32 %v2266_v58, %v3510_v57  ;;  %v1144_v63 = vpop.f32.mrb[47].mxu1 }
 0x5c2   :  { %v1164_v25 = vmul.f32 %v3510_v57, %v1144_v63 }
 0x5c3   :  { %v1169_v1 = vadd.f32 %v1165_v61, %v3242_v32 }
 0x5c4   :  { %v1168_v7 = vadd.f32 %v1164_v25, %v3240_v17  ;;  %v2269_v46 = vpop.f32.mrb[48].mxu1 }
 0x5c5   :  { %v1855_v10 = vmul.f32 -1.442695, %v1169_v1  ;;  %v1167_v54 = vmul.f32 %v2269_v46, %v3510_v57  ;;  %v1154_v56 = vpop.f32.mrb[49].mxu1 }
 0x5c6   :  { %v1854_v11 = vmul.f32 -1.442695, %v1168_v7  ;;  %v1166_v15 = vmul.f32 %v3510_v57, %v1154_v56 }
 0x5c7   :  { %2593 = vpow2.f32 %v1855_v10  ;;  %v1171_v18 = vadd.f32 %v1167_v54, %v3253_v55  ;;  %v1349_v55 = vrot.slane %v1306_v50, %v822_v5 }
 0x5c8   :  { %2595 = vpow2.f32 %v1854_v11  ;;  %v1170_v30 = vadd.f32 %v1166_v15, %v3246_v42 }
 0x5c9   :  { %v1857_v26 = vmul.f32 -1.442695, %v1171_v18 }
 0x5ca   :  { %v1856_v60 = vmul.f32 -1.442695, %v1170_v30 }
 0x5cb   :  { %2597 = vpow2.f32 %v1857_v26 }
 0x5cc   :  { %2599 = vpow2.f32 %v1856_v60 }
 0x5d1   :  { %v2594_v32 = vpop.eup %2593 }
 0x5d2   :  { %v2596_v17 = vpop.eup %2595  ;;  %v1185_v62 = vadd.f32 1.0, %v2594_v32 }
 0x5d3   :  { %v1184_v23 = vadd.f32 1.0, %v2596_v17 }
 0x5d4   :  { %2601 = vrcp.f32 %v1185_v62 }
 0x5d5   :  { %v2598_v48 = vpop.eup %2597  ;;  %2603 = vrcp.f32 %v1184_v23 }
 0x5d6   :  { %v2600_v21 = vpop.eup %2599  ;;  %v1187_v51 = vadd.f32 1.0, %v2598_v48 }
 0x5d7   :  { %v1186_v59 = vadd.f32 1.0, %v2600_v21 }
 0x5d8   :  { %2605 = vrcp.f32 %v1187_v51 }
 0x5d9   :  { %2607 = vrcp.f32 %v1186_v59 }
 0x5da   :  { %v2315_v42 = vpop.f32.mrb[50].mxu1 }
 0x5db   :  { %v1446_v9 = vadd.f32 %v2315_v42, %v1349_v55  ;;  %v1440_v13 = vpop.f32.mrb[51].mxu1 }
 0x5dc   :  { %v1441_v24 = vadd.f32 %v1440_v13, %v1349_v55 }
 0x5dd   :  { %v1482_v27 = vsel %vm953_vm2, %v1446_v9, -inf }
 0x5de   :  { %v2602_v20 = vpop.eup %2601  ;;  %1483 = vmax.xlane.f32.xlu1 %v1482_v27  ;;  %v1479_v16 = vsel %vm953_vm2, %v1441_v24, -inf }
 0x5df   :  { %v2604_v14 = vpop.eup %2603  ;;  %1197 = vst.msk [vmem:[%s3607_s5 + $0x8] sm:$0xff] %vm953_vm2, %v2602_v20  ;;  %1480 = vmax.xlane.f32.xlu0 %v1479_v16 }
 0x5e0   :  { %1196 = vst.msk [vmem:[%s3607_s5] sm:$0xff] %vm953_vm2, %v2604_v14 }
 0x5e2   :  { %v2606_v3 = vpop.eup %2605  ;;  %v2318_v5 = vpop.f32.mrb[52].mxu1 }
 0x5e3   :  { %v2608_v22 = vpop.eup %2607  ;;  %1199 = vst.msk [vmem:[%s3607_s5 + $0x18] sm:$0xff] %vm953_vm2, %v2606_v3  ;;  %v1456_v52 = vadd.f32 %v2318_v5, %v1349_v55  ;;  %v1450_v31 = vpop.f32.mrb[53].mxu1 }
 0x5e4   :  { %1198 = vst.msk [vmem:[%s3607_s5 + $0x10] sm:$0xff] %vm953_vm2, %v2608_v22  ;;  %v1451_v36 = vadd.f32 %v1450_v31, %v1349_v55 }
 0x5e5   :  { %v1488_v38 = vsel %vm953_vm2, %v1456_v52, -inf }
 0x5e6   :  { %1489 = vmax.xlane.f32.xlu0 %v1488_v38  ;;  %v1485_v8 = vsel %vm953_vm2, %v1451_v36, -inf }
 0x5ea   :  { %v2321_v39 = vpop.f32.mrb[54].mxu1  ;;  %1486 = vmax.xlane.f32.xlu0 %v1485_v8 }
 0x5eb   :  { %v1466_v44 = vadd.f32 %v2321_v39, %v1349_v55  ;;  %v1460_v33 = vpop.f32.mrb[55].mxu1 }
 0x5ec   :  { %v1461_v12 = vadd.f32 %v1460_v33, %v1349_v55 }
 0x5ed   :  { %v1494_v37 = vsel %vm953_vm2, %v1466_v44, -inf }
 0x5ee   :  { %1495 = vmax.xlane.f32.xlu0 %v1494_v37  ;;  %v1491_v47 = vsel %vm953_vm2, %v1461_v12, -inf }
 0x5f2   :  { %v2324_v0 = vpop.f32.mrb[56].mxu1  ;;  %1492 = vmax.xlane.f32.xlu0 %v1491_v47 }
 0x5f3   :  { %v1476_v41 = vadd.f32 %v2324_v0, %v1349_v55  ;;  %v1470_v49 = vpop.f32.mrb[57].mxu1 }
 0x5f4   :  { %v1471_v28 = vadd.f32 %v1470_v49, %v1349_v55 }
 0x5f5   :  { %v1500_v45 = vsel %vm953_vm2, %v1476_v41, -inf }
 0x5f6   :  { %v1497_v50 = vsel %vm953_vm2, %v1471_v28, -inf }
 0x5f7   :  { %1498 = vmax.xlane.f32.xlu0 %v1497_v50 }
 0x5fb   :  { %1501 = vmax.xlane.f32.xlu0 %v1500_v45 }
 0x66b   :  { %v1484_v58 = vpop.xlane.xlu1 %1483 }
 0x66c   :  { %v1504_v61 = vsub.f32 %v1446_v9, %v1484_v58  ;;  %v1481_v63 = vpop.xlane.xlu0 %1480 }
 0x66d   :  { %v1503_v25 = vsub.f32 %v1441_v24, %v1481_v63 }
 0x66e   :  { %v1513_v1 = vmul.f32 1.442695, %v1504_v61 }
 0x66f   :  { %v1511_v7 = vmul.f32 1.442695, %v1503_v25 }
 0x670   :  { %2609 = vpow2.f32 %v1513_v1 }
 0x671   :  { %2611 = vpow2.f32 %v1511_v7 }
 0x673   :  { %v1490_v46 = vpop.xlane.xlu0 %1489 }
 0x674   :  { %v1506_v10 = vsub.f32 %v1456_v52, %v1490_v46 }
 0x676   :  { %v1517_v15 = vmul.f32 1.442695, %v1506_v10 }
 0x677   :  { %v1487_v54 = vpop.xlane.xlu0 %1486 }
 0x678   :  { %v1505_v56 = vsub.f32 %v1451_v36, %v1487_v54 }
 0x67a   :  { %v2610_v11 = vpop.eup %2609  ;;  %v1515_v18 = vmul.f32 1.442695, %v1505_v56 }
 0x67b   :  { %v1496_v30 = vpop.xlane.xlu0 %1495  ;;  %v1530_v26 = vsel %vm953_vm2, %v2610_v11, 0.0  ;;  %v2612_v60 = vpop.eup %2611 }
 0x67c   :  { %2613 = vpow2.f32 %v1515_v18  ;;  %v1508_v32 = vsub.f32 %v1466_v44, %v1496_v30  ;;  %1531 = vadd.xlane.f32.xlu0 %v1530_v26  ;;  %v1527_v23 = vsel %vm953_vm2, %v2612_v60, 0.0 }
 0x67d   :  { %2615 = vpow2.f32 %v1517_v15 }
 0x67e   :  { %v1521_v17 = vmul.f32 1.442695, %v1508_v32  ;;  %v1312_v32 = vadd.f32 %v3432_v53, %v3456_v4 }
 0x67f   :  { %v1493_v62 = vpop.xlane.xlu0 %1492 }
 0x680   :  { %2617 = vpow2.f32 %v1521_v17  ;;  %v1507_v48 = vsub.f32 %v1461_v12, %v1493_v62  ;;  %1528 = vadd.xlane.f32.xlu0 %v1527_v23 }
 0x682   :  { %v1519_v21 = vmul.f32 1.442695, %v1507_v48 }
 0x684   :  { %2619 = vpow2.f32 %v1519_v21  ;;  %v1499_v51 = vpop.xlane.xlu0 %1498 }
 0x685   :  { %v1509_v59 = vsub.f32 %v1471_v28, %v1499_v51 }
 0x686   :  { %v2614_v55 = vpop.eup %2613 }
 0x687   :  { %v1523_v42 = vmul.f32 1.442695, %v1509_v59  ;;  %v1533_v9 = vsel %vm953_vm2, %v2614_v55, 0.0  ;;  %v2616_v13 = vpop.eup %2615 }
 0x688   :  { %1534 = vadd.xlane.f32.xlu0 %v1533_v9  ;;  %v1502_v24 = vpop.xlane.xlu0 %1501  ;;  %v1536_v14 = vsel %vm953_vm2, %v2616_v13, 0.0 }
 0x689   :  { %2621 = vpow2.f32 %v1523_v42  ;;  %v1510_v27 = vsub.f32 %v1476_v41, %v1502_v24 }
 0x68a   :  { %v2618_v20 = vpop.eup %2617 }
 0x68b   :  { %v1525_v16 = vmul.f32 1.442695, %v1510_v27  ;;  %v1542_v3 = vsel %vm953_vm2, %v2618_v20, 0.0 }
 0x68c   :  { %1537 = vadd.xlane.f32.xlu0 %v1536_v14  ;;  %1543 = vadd.xlane.f32.xlu1 %v1542_v3 }
 0x68d   :  { %2623 = vpow2.f32 %v1525_v16 }
 0x68e   :  { %v2620_v5 = vpop.eup %2619 }
 0x68f   :  { %v1539_v22 = vsel %vm953_vm2, %v2620_v5, 0.0 }
 0x690   :  { %1540 = vadd.xlane.f32.xlu0 %v1539_v22 }
 0x693   :  { %v2622_v52 = vpop.eup %2621 }
 0x694   :  { %v1545_v31 = vsel %vm953_vm2, %v2622_v52, 0.0 }
 0x695   :  { %1546 = vadd.xlane.f32.xlu0 %v1545_v31 }
 0x697   :  { %v2624_v36 = vpop.eup %2623 }
 0x698   :  { %v1548_v38 = vsel %vm953_vm2, %v2624_v36, 0.0 }
 0x699   :  { %1549 = vadd.xlane.f32.xlu1 %v1548_v38 }
 0x709   :  { %v1532_v8 = vpop.xlane.xlu0 %1531 }
 0x70a   :  { %2625 = vrcp.f32 %v1532_v8 }
 0x70d   :  { %v1529_v39 = vpop.xlane.xlu0 %1528 }
 0x70e   :  { %2627 = vrcp.f32 %v1529_v39 }
 0x714   :  { %v2626_v33 = vpop.eup %2625 }
 0x715   :  { %v1535_v44 = vpop.xlane.xlu0 %1534  ;;  %v1560_v41 = vmul.f32 %v2626_v33, %v2610_v11 }
 0x716   :  { %2629 = vrcp.f32 %v1535_v44 }
 0x718   :  { %v2628_v12 = vpop.eup %2627 }
 0x719   :  { %v1544_v37 = vpop.xlane.xlu1 %1543  ;;  %v1538_v47 = vpop.xlane.xlu0 %1537  ;;  %v1559_v0 = vmul.f32 %v2628_v12, %v2612_v60  ;;  %v1311_v60 = vadd.f32 %v3430_v40, %v3486_v34 }
 0x71a   :  { %2631 = vrcp.f32 %v1538_v47 }
 0x71b   :  { %v2527_v49 = vpack.c.bf16 %v1560_v41, %v1559_v0  ;;  %2633 = vrcp.f32 %v1544_v37 }
 0x71d   :  { %2529 = vmatprep.subr.msk.bf16.mxu0 %vm3463_vm3, %v2527_v49  ;;  %v1541_v28 = vpop.xlane.xlu0 %1540 }
 0x71e   :  { %2635 = vrcp.f32 %v1541_v28  ;;  %2532 = vmatpush3.bf16.xpose.msk.msra.mxu0 %vm3463_vm3, %v2527_v49 }
 0x720   :  { %v2630_v45 = vpop.eup %2629 }
 0x721   :  { %v1561_v25 = vmul.f32 %v2630_v45, %v2614_v55 }
 0x722   :  { %v1547_v50 = vpop.xlane.xlu0 %1546 }
 0x723   :  { %2637 = vrcp.f32 %v1547_v50 }
 0x724   :  { %v2632_v58 = vpop.eup %2631 }
 0x725   :  { %v2634_v61 = vpop.eup %2633  ;;  %v1562_v1 = vmul.f32 %v2632_v58, %v2616_v13 }
 0x726   :  { %v1550_v63 = vpop.xlane.xlu1 %1549  ;;  %v1564_v54 = vmul.f32 %v2634_v61, %v2618_v20 }
 0x727   :  { %2639 = vrcp.f32 %v1550_v63  ;;  %v2533_v46 = vpack.c.bf16 %v1562_v1, %v1561_v25 }
 0x728   :  { %v2636_v7 = vpop.eup %2635 }
 0x729   :  { %v1563_v10 = vmul.f32 %v2636_v7, %v2620_v5  ;;  %2535 = vmatprep.subr.msk.bf16.mxu0 %vm3463_vm3, %v2533_v46 }
 0x72a   :  { %2538 = vmatpush3.bf16.xpose.msk.msra.mxu0 %vm3463_vm3, %v2533_v46 }
 0x72b   :  { %v2539_v56 = vpack.c.bf16 %v1564_v54, %v1563_v10 }
 0x72d   :  { %2541 = vmatprep.subr.msk.bf16.mxu0 %vm3463_vm3, %v2539_v56  ;;  %v2638_v11 = vpop.eup %2637 }
 0x72e   :  { %v1565_v18 = vmul.f32 %v2638_v11, %v2622_v52 }
 0x731   :  { %v2640_v15 = vpop.eup %2639 }
 0x732   :  { %v1566_v30 = vmul.f32 %v2640_v15, %v2624_v36  ;;  %2544 = vmatpush3.bf16.xpose.msk.msra.mxu0 %vm3463_vm3, %v2539_v56 }
 0x734   :  { %v2545_v26 = vpack.c.bf16 %v1566_v30, %v1565_v18 }
 0x736   :  { %2547 = vmatprep.subr.msk.bf16.mxu0 %vm3463_vm3, %v2545_v26 }
 0x73a   :  { %2550 = vmatpush3.bf16.xpose.msk.msra.mxu0 %vm3463_vm3, %v2545_v26 }
 0x741   :  { %2342 = vmatmul.mubr.msk.f32.vlgmr.msra.gmra.mrb[62].mxu0 %vm953_vm2, %v1311_v60 }
 0x742   :  { %2344 = vmatprep.mubr.msk.f32.mxu0 %vm953_vm2, %v1312_v32 }
 0x745   :  { %2345 = vmatmul.mubr.msk.f32.gmra.mrb[64].mxu0 %vm953_vm2, %v3479_v29 }
 0x814   :  { %v2343_v17 = vpop.f32.mrb[62].mxu0 }
 0x815   :  { %v1689_v62 = vmul.f32 %v2343_v17, %v3510_v57  ;;  %v1669_v23 = vpop.f32.mrb[63].mxu0 }
 0x816   :  { %v1688_v35 = vmul.f32 %v1669_v23, %v3510_v57 }
 0x817   :  { %v1693_v48 = vadd.f32 %v1689_v62, %v3280_v19 }
 0x818   :  { %v1692_v40 = vadd.f32 %v1688_v35, %v3260_v43  ;;  %v2346_v34 = vpop.f32.mrb[64].mxu0 }
 0x819   :  { %v1888_v21 = vmul.f32 -1.442695, %v1693_v48  ;;  %v1691_v53 = vmul.f32 %v2346_v34, %v3510_v57  ;;  %v1679_v4 = vpop.f32.mrb[65].mxu0 }
 0x81a   :  { %v1887_v51 = vmul.f32 -1.442695, %v1692_v40  ;;  %v1690_v59 = vmul.f32 %v1679_v4, %v3510_v57 }
 0x81b   :  { %2641 = vpow2.f32 %v1888_v21  ;;  %v1695_v29 = vadd.f32 %v1691_v53, %v3310_v6 }
 0x81c   :  { %2643 = vpow2.f32 %v1887_v51  ;;  %v1694_v55 = vadd.f32 %v1690_v59, %v3297_v2 }
 0x81d   :  { %v1890_v42 = vmul.f32 -1.442695, %v1695_v29 }
 0x81e   :  { %v1889_v9 = vmul.f32 -1.442695, %v1694_v55 }
 0x81f   :  { %2645 = vpow2.f32 %v1890_v42 }
 0x820   :  { %2647 = vpow2.f32 %v1889_v9 }
 0x825   :  { %v2642_v19 = vpop.eup %2641 }
 0x826   :  { %v2644_v43 = vpop.eup %2643  ;;  %v1709_v13 = vadd.f32 1.0, %v2642_v19 }
 0x827   :  { %v1708_v24 = vadd.f32 1.0, %v2644_v43 }
 0x828   :  { %2649 = vrcp.f32 %v1709_v13 }
 0x829   :  { %v2646_v27 = vpop.eup %2645  ;;  %2651 = vrcp.f32 %v1708_v24 }
 0x82a   :  { %v2648_v20 = vpop.eup %2647  ;;  %v1711_v16 = vadd.f32 1.0, %v2646_v27 }
 0x82b   :  { %v1710_v57 = vadd.f32 1.0, %v2648_v20 }
 0x82c   :  { %2653 = vrcp.f32 %v1711_v16 }
 0x82d   :  { %2655 = vrcp.f32 %v1710_v57 }
 0x832   :  { %v2650_v6 = vpop.eup %2649 }
 0x833   :  { %v2652_v14 = vpop.eup %2651  ;;  %1892 = vst.msk [vmem:[%s3607_s5 + $0x28] sm:$0xff] %vm953_vm2, %v2650_v6 }
 0x834   :  { %1891 = vst.msk [vmem:[%s3607_s5 + $0x20] sm:$0xff] %vm953_vm2, %v2652_v14 }
 0x836   :  { %v2654_v2 = vpop.eup %2653 }
 0x837   :  { %v2656_v3 = vpop.eup %2655  ;;  %1894 = vst.msk [vmem:[%s3607_s5 + $0x38] sm:$0xff] %vm953_vm2, %v2654_v2 }
 0x838   :  { %1893 = vst.msk [vmem:[%s3607_s5 + $0x30] sm:$0xff] %vm953_vm2, %v2656_v3 }

</bundles_post_ra>
